<compile_context>
chip_gen: v7x
topology: tpu7x:2x2x1
jax: 0.10.0
libtpu: 0.0.40
codegen_flags: <defaults>
</compile_context>

<pallas_src>
import functools

import jax
import jax.numpy as jnp
from jax.experimental import pallas as pl
from jax.experimental.pallas import tpu as pltpu


def _round_up(x, m):
    return ((x + m - 1) // m) * m


# dot_general dims for A(m,k) x B(n,k)^T -> (m,n)  (flash-attention style trans_b)
_TRANS_B_DIMS = (((1,), (1,)), ((), ()))


def attention_sentiment_kernel(
    idx_ref,        # SMEM (L,) int32  -- scalar-prefetched token ids (last batch col)
    emb_hbm,        # HBM  (vocab, Ep) -- padded embedding table (memory_space=pl.ANY)
    wqkv_ref,       # VMEM (Ep, 3*Ep)  -- fused [wq.T*scale | wk.T | wv.T]
    bqkv_ref,       # VMEM (1, 3*Ep)
    wof_ref,        # VMEM (1, Ep)     -- fused (fc o out_proj) row
    bof_ref,        # VMEM (1, 1)      -- fused bias
    o_ref,          # VMEM (1, Lp)     -- lane-dense sigmoid output
    x_buf,          # VMEM scratch (Lp, Ep) -- gathered embedding rows
    dma_sems,       # DMA semaphores (Lp,)
    *, l_actual,
):
    lp, ep = x_buf.shape

    # Zero the padded sublane rows first (disjoint from the rows the DMAs write),
    # so padded k/v rows are finite (their softmax weight underflows to exactly 0).
    if lp != l_actual:
        x_buf[pl.ds(l_actual, lp - l_actual), :] = jnp.zeros(
            (lp - l_actual, ep), x_buf.dtype)

    # Gather the L embedding rows for batch column N-1 straight from HBM.
    for l in range(l_actual):
        pltpu.make_async_copy(
            emb_hbm.at[pl.ds(idx_ref[l], 1), :],
            x_buf.at[pl.ds(l, 1), :],
            dma_sems.at[l],
        ).start()
    for l in range(l_actual):
        pltpu.make_async_copy(
            emb_hbm.at[pl.ds(0, 1), :],
            x_buf.at[pl.ds(l, 1), :],
            dma_sems.at[l],
        ).wait()

    x = x_buf[...]

    # Single fused QKV in-projection (attention scale already folded into the q slice).
    qkv = jnp.dot(x, wqkv_ref[...], preferred_element_type=jnp.float32)
    qkv = qkv + bqkv_ref[...]
    q = qkv[:, :ep]           # 128-aligned lane slices: no relayout
    k = qkv[:, ep:2 * ep]
    v = qkv[:, 2 * ep:]

    # Scores over the sequence axis: s = q @ k.T (contraction over E on the MXU).
    s = jax.lax.dot_general(q, k, _TRANS_B_DIMS,
                            preferred_element_type=jnp.float32)        # (Lp, Lp)

    if lp != l_actual:
        # Padded key positions get zero attention weight.
        key_idx = jax.lax.broadcasted_iota(jnp.int32, s.shape, dimension=1)
        s = jnp.where(key_idx < l_actual, s, -1e30)

    # Numerically-stable softmax with deferred normalization.
    m = jnp.max(s, axis=-1, keepdims=True)
    p = jnp.exp(s - m)                                                  # unnormalized
    a = jnp.dot(p, v, preferred_element_type=jnp.float32)               # (Lp, Ep)

    # Fused out_proj + fc, computed directly in lane-dense (1, Lp) layout, then
    # divided once by the lane-dense row sums (deferred softmax denominator).
    raw_t = jax.lax.dot_general(wof_ref[...].astype(jnp.float32), a, _TRANS_B_DIMS,
                                preferred_element_type=jnp.float32)     # (1, Lp)
    ones_row = jnp.ones((1, lp), jnp.float32)
    sum_t = jax.lax.dot_general(ones_row, p, _TRANS_B_DIMS,
                                preferred_element_type=jnp.float32)     # (1, Lp)
    o_ref[...] = jax.nn.sigmoid(raw_t / sum_t + bof_ref[...])


def prepare_params(params, *, use_bf16=False):
    """One-time weight preparation. Call once, reuse the result across forwards.

    Folds: Linear transposes, 1/sqrt(E) attention scale (into the q slice), QKV
    fusion into one (Ep, 3Ep) matrix, out_proj+fc fusion into a (1, Ep) row, and
    lane/sublane padding (E -> Ep multiple of 128). Also pads the embedding table
    columns so in-kernel row DMAs cover full Ep lanes.
    """
    emb = params["embedding"].astype(jnp.float32)
    E = emb.shape[1]
    Ep = _round_up(max(E, 128), 128)
    scale = 1.0 / float(E) ** 0.5
    w_dtype = jnp.bfloat16 if use_bf16 else jnp.float32

    def pad2(mat, rows, cols):
        mat = jnp.asarray(mat, jnp.float32)
        return jnp.pad(mat, ((0, rows - mat.shape[0]), (0, cols - mat.shape[1])))

    # Fused in-projection: x @ [wq.T*scale | wk.T | wv.T]   (Linear is x @ W.T).
    wqkv = jnp.concatenate(
        [pad2(params["wq"].T * scale, Ep, Ep),
         pad2(params["wk"].T, Ep, Ep),
         pad2(params["wv"].T, Ep, Ep)], axis=1).astype(w_dtype)          # (Ep, 3Ep)
    bqkv = jnp.concatenate(
        [pad2((params["bq"] * scale).reshape(1, E), 1, Ep),
         pad2(params["bk"].reshape(1, E), 1, Ep),
         pad2(params["bv"].reshape(1, E), 1, Ep)], axis=1)               # (1, 3Ep) f32

    # Fold out_proj + fc: logit = a @ (wo.T @ wfc.T) + (bo @ wfc.T + bfc).
    wof = pad2(params["wfc"] @ params["wo"], 1, Ep)                      # (1, Ep) f32
    bof = (params["bo"] @ params["wfc"].T + params["bfc"]).reshape(1, 1).astype(jnp.float32)

    emb_p = pad2(emb, emb.shape[0], Ep).astype(w_dtype)                  # (vocab, Ep)
    return {"emb": emb_p, "wqkv": wqkv, "bqkv": bqkv, "wof": wof, "bof": bof}


@jax.jit
def attention_sentiment_forward(input_words, prepared):
    """input_words: (L, N) int32. Returns (L,) float32, matching the PyTorch forward."""
    L = input_words.shape[0]
    emb = prepared["emb"]
    wqkv = prepared["wqkv"]
    Ep = wqkv.shape[0]
    Lp = _round_up(max(L, 8), 8)

    # Only batch column n = N-1 survives the final `x.view(L, -1)[:, -1]`.
    idx = input_words[:, -1].astype(jnp.int32)                           # (L,)

    full2 = lambda i, idx_ref: (0, 0)
    grid_spec = pltpu.PrefetchScalarGridSpec(
        num_scalar_prefetch=1,                    # idx -> SMEM
        grid=(1,),
        in_specs=[
            pl.BlockSpec(memory_space=pl.ANY),    # embedding table stays in HBM
            pl.BlockSpec((Ep, 3 * Ep), full2),    # wqkv
            pl.BlockSpec((1, 3 * Ep), full2),     # bqkv
            pl.BlockSpec((1, Ep), full2),         # wof (fused out_proj+fc)
            pl.BlockSpec((1, 1), full2),          # bof
        ],
        out_specs=pl.BlockSpec((1, Lp), full2),
        scratch_shapes=[
            pltpu.VMEM((Lp, Ep), emb.dtype),      # gathered x rows
            pltpu.SemaphoreType.DMA((Lp,)),
        ],
    )
    out = pl.pallas_call(
        functools.partial(attention_sentiment_kernel, l_actual=L),
        out_shape=jax.ShapeDtypeStruct((1, Lp), jnp.float32),
        grid_spec=grid_spec,
        compiler_params=pltpu.CompilerParams(
            dimension_semantics=("arbitrary",)),
    )(idx, emb, wqkv, prepared["bqkv"], prepared["wof"], prepared["bof"])

    return out[0, :L]                                                    # (L,)


def attention_sentiment_reference(input_words, params):
    """Pure-JAX reference of the full PyTorch forward (all N columns), for validation."""
    emb = params["embedding"][input_words]                               # (L, N, E)
    E = emb.shape[-1]
    q = emb @ params["wq"].T + params["bq"]
    k = emb @ params["wk"].T + params["bk"]
    v = emb @ params["wv"].T + params["bv"]
    s = jnp.einsum("lne,mne->nlm", q, k) / jnp.sqrt(jnp.float32(E))
    p = jax.nn.softmax(s, axis=-1)
    a = jnp.einsum("nlm,mne->lne", p, v)
    out = a @ params["wo"].T + params["bo"]
    logit = out @ params["wfc"].T + params["bfc"]
    sig = jax.nn.sigmoid(logit)                                          # (L, N, 1)
    return sig.reshape(emb.shape[0], -1)[:, -1]


def init_params(key, vocab_size, embedding_dim, output_size):
    ks = jax.random.split(key, 8)
    std = 0.05
    E = embedding_dim
    return {
        "embedding": jax.random.normal(ks[0], (vocab_size, E), jnp.float32) * std,
        # nn.MultiheadAttention in_proj (split into q/k/v) + out_proj
        "wq": jax.random.normal(ks[1], (E, E), jnp.float32) * std,
        "wk": jax.random.normal(ks[2], (E, E), jnp.float32) * std,
        "wv": jax.random.normal(ks[3], (E, E), jnp.float32) * std,
        "bq": jnp.zeros((E,), jnp.float32),
        "bk": jnp.zeros((E,), jnp.float32),
        "bv": jnp.zeros((E,), jnp.float32),
        "wo": jax.random.normal(ks[4], (E, E), jnp.float32) * std,
        "bo": jax.random.normal(ks[5], (E,), jnp.float32) * std,
        # fc: Linear(E, output_size)
        "wfc": jax.random.normal(ks[6], (output_size, E), jnp.float32) * std,
        "bfc": jax.random.normal(ks[7], (output_size,), jnp.float32) * std,
    }


if __name__ == "__main__":
    # Small shapes consistent with the module (PyTorch: L=25, N=200, E=300, out=1).
    # L=25 / E=96 deliberately exercise the L->32 sublane and E->128 lane padding.
    L, N, E = 25, 16, 96
    vocab_size = 50
    output_size = 1

    key = jax.random.PRNGKey(0)
    k_param, k_words = jax.random.split(key)
    params = init_params(k_param, vocab_size, E, output_size)
    input_words = jax.random.randint(k_words, (L, N), 0, vocab_size, dtype=jnp.int32)

    # One-time weight preparation (hoisted out of the per-call path).
    prepared = prepare_params(params, use_bf16=False)
    prepared = jax.tree_util.tree_map(jax.block_until_ready, prepared)

    out = attention_sentiment_forward(input_words, prepared)
    out = jax.block_until_ready(out)

    ref = attention_sentiment_reference(input_words, params)
    assert out.shape == (L,), out.shape
    assert jnp.allclose(out, ref, atol=1e-5, rtol=1e-5), (out, ref)

    print("KERNEL_OK")
</pallas_src>

<mosaic_0001>
module attributes {stable_mosaic.version = 11 : i64} {
  func.func @attention_sentiment_kernel(%arg0: i32, %arg1: memref<25xi32, #tpu.memory_space<smem>>, %arg2: memref<50x128xf32, #tpu.memory_space<any>>, %arg3: memref<128x384xf32, #tpu.memory_space<vmem>>, %arg4: memref<1x384xf32, #tpu.memory_space<vmem>>, %arg5: memref<1x128xf32, #tpu.memory_space<vmem>>, %arg6: memref<1x1xf32, #tpu.memory_space<vmem>>, %arg7: memref<1x32xf32, #tpu.memory_space<vmem>>, %arg8: memref<32x128xf32, #tpu.memory_space<vmem>>, %arg9: memref<32x!tpu.dma_semaphore, #tpu.memory_space<semaphore_mem>>) attributes {dimension_semantics = [#tpu.dimension_semantics<arbitrary>], iteration_bounds = array<i64: 1>, scalar_prefetch = 1 : i64, scratch_operands = 2 : i64, tpu.core_type = #tpu.core_type<tc>, window_params = [{}, {pipeline_mode = #tpu.pipeline_mode<synchronous>, transform_indices = @transform_1, window_bounds = array<i64: 128, 384>}, {pipeline_mode = #tpu.pipeline_mode<synchronous>, transform_indices = @transform_2, window_bounds = array<i64: 1, 384>}, {pipeline_mode = #tpu.pipeline_mode<synchronous>, transform_indices = @transform_3, window_bounds = array<i64: 1, 128>}, {pipeline_mode = #tpu.pipeline_mode<synchronous>, transform_indices = @transform_4, window_bounds = array<i64: 1, 1>}, {pipeline_mode = #tpu.pipeline_mode<synchronous>, transform_indices = @transform_5, window_bounds = array<i64: 1, 32>}]} {
    %cst = arith.constant 0.000000e+00 : f32
    %0 = vector.broadcast %cst : f32 to vector<7x128xf32>
    %c25 = arith.constant 25 : index
    %c0 = arith.constant 0 : index
    %1 = vector.load %arg8[%c25, %c0] : memref<32x128xf32, #tpu.memory_space<vmem>>, vector<7x128xf32>
    tpu.vector_store %arg8[%c25, %c0], %0 {strides = array<i32>} : memref<32x128xf32, #tpu.memory_space<vmem>>, vector<7x128xf32>,
    %c0_0 = arith.constant 0 : index
    %2 = memref.load %arg1[%c0_0] : memref<25xi32, #tpu.memory_space<smem>>
    %c0_i32 = arith.constant 0 : i32
    %c0_i32_1 = arith.constant 0 : i32
    %3 = tpu.memref_slice %arg2[%2, %c0_i32_1] : memref<50x128xf32, #tpu.memory_space<any>> -> memref<1x128xf32, #tpu.memory_space<any>>
    %c0_i32_2 = arith.constant 0 : i32
    %c0_i32_3 = arith.constant 0 : i32
    %4 = tpu.memref_slice %arg8[%c0_i32_2, %c0_i32_3] : memref<32x128xf32, #tpu.memory_space<vmem>> -> memref<1x128xf32, #tpu.memory_space<vmem>>
    %5 = tpu.memref_slice %arg9[%c0_i32] : memref<32x!tpu.dma_semaphore, #tpu.memory_space<semaphore_mem>> -> memref<1x!tpu.dma_semaphore, #tpu.memory_space<semaphore_mem>>
    %6 = tpu.memref_squeeze %5 : memref<1x!tpu.dma_semaphore, #tpu.memory_space<semaphore_mem>> -> memref<!tpu.dma_semaphore, #tpu.memory_space<semaphore_mem>>
    tpu.enqueue_dma source(%3 : memref<1x128xf32, #tpu.memory_space<any>>) target(%4 : memref<1x128xf32, #tpu.memory_space<vmem>>) target_semaphore(%6 : memref<!tpu.dma_semaphore, #tpu.memory_space<semaphore_mem>>)
    %c1 = arith.constant 1 : index
    %7 = memref.load %arg1[%c1] : memref<25xi32, #tpu.memory_space<smem>>
    %c1_i32 = arith.constant 1 : i32
    %c0_i32_4 = arith.constant 0 : i32
    %8 = tpu.memref_slice %arg2[%7, %c0_i32_4] : memref<50x128xf32, #tpu.memory_space<any>> -> memref<1x128xf32, #tpu.memory_space<any>>
    %c1_i32_5 = arith.constant 1 : i32
    %c0_i32_6 = arith.constant 0 : i32
    %9 = tpu.memref_slice %arg8[%c1_i32_5, %c0_i32_6] : memref<32x128xf32, #tpu.memory_space<vmem>> -> memref<1x128xf32, #tpu.memory_space<vmem>>
    %10 = tpu.memref_slice %arg9[%c1_i32] : memref<32x!tpu.dma_semaphore, #tpu.memory_space<semaphore_mem>> -> memref<1x!tpu.dma_semaphore, #tpu.memory_space<semaphore_mem>>
    %11 = tpu.memref_squeeze %10 : memref<1x!tpu.dma_semaphore, #tpu.memory_space<semaphore_mem>> -> memref<!tpu.dma_semaphore, #tpu.memory_space<semaphore_mem>>
    tpu.enqueue_dma source(%8 : memref<1x128xf32, #tpu.memory_space<any>>) target(%9 : memref<1x128xf32, #tpu.memory_space<vmem>>) target_semaphore(%11 : memref<!tpu.dma_semaphore, #tpu.memory_space<semaphore_mem>>)
    %c2 = arith.constant 2 : index
    %12 = memref.load %arg1[%c2] : memref<25xi32, #tpu.memory_space<smem>>
    %c2_i32 = arith.constant 2 : i32
    %c0_i32_7 = arith.constant 0 : i32
    %13 = tpu.memref_slice %arg2[%12, %c0_i32_7] : memref<50x128xf32, #tpu.memory_space<any>> -> memref<1x128xf32, #tpu.memory_space<any>>
    %c2_i32_8 = arith.constant 2 : i32
    %c0_i32_9 = arith.constant 0 : i32
    %14 = tpu.memref_slice %arg8[%c2_i32_8, %c0_i32_9] : memref<32x128xf32, #tpu.memory_space<vmem>> -> memref<1x128xf32, #tpu.memory_space<vmem>>
    %15 = tpu.memref_slice %arg9[%c2_i32] : memref<32x!tpu.dma_semaphore, #tpu.memory_space<semaphore_mem>> -> memref<1x!tpu.dma_semaphore, #tpu.memory_space<semaphore_mem>>
    %16 = tpu.memref_squeeze %15 : memref<1x!tpu.dma_semaphore, #tpu.memory_space<semaphore_mem>> -> memref<!tpu.dma_semaphore, #tpu.memory_space<semaphore_mem>>
    tpu.enqueue_dma source(%13 : memref<1x128xf32, #tpu.memory_space<any>>) target(%14 : memref<1x128xf32, #tpu.memory_space<vmem>>) target_semaphore(%16 : memref<!tpu.dma_semaphore, #tpu.memory_space<semaphore_mem>>)
    %c3 = arith.constant 3 : index
    %17 = memref.load %arg1[%c3] : memref<25xi32, #tpu.memory_space<smem>>
    %c3_i32 = arith.constant 3 : i32
    %c0_i32_10 = arith.constant 0 : i32
    %18 = tpu.memref_slice %arg2[%17, %c0_i32_10] : memref<50x128xf32, #tpu.memory_space<any>> -> memref<1x128xf32, #tpu.memory_space<any>>
    %c3_i32_11 = arith.constant 3 : i32
    %c0_i32_12 = arith.constant 0 : i32
    %19 = tpu.memref_slice %arg8[%c3_i32_11, %c0_i32_12] : memref<32x128xf32, #tpu.memory_space<vmem>> -> memref<1x128xf32, #tpu.memory_space<vmem>>
    %20 = tpu.memref_slice %arg9[%c3_i32] : memref<32x!tpu.dma_semaphore, #tpu.memory_space<semaphore_mem>> -> memref<1x!tpu.dma_semaphore, #tpu.memory_space<semaphore_mem>>
    %21 = tpu.memref_squeeze %20 : memref<1x!tpu.dma_semaphore, #tpu.memory_space<semaphore_mem>> -> memref<!tpu.dma_semaphore, #tpu.memory_space<semaphore_mem>>
    tpu.enqueue_dma source(%18 : memref<1x128xf32, #tpu.memory_space<any>>) target(%19 : memref<1x128xf32, #tpu.memory_space<vmem>>) target_semaphore(%21 : memref<!tpu.dma_semaphore, #tpu.memory_space<semaphore_mem>>)
    %c4 = arith.constant 4 : index
    %22 = memref.load %arg1[%c4] : memref<25xi32, #tpu.memory_space<smem>>
    %c4_i32 = arith.constant 4 : i32
    %c0_i32_13 = arith.constant 0 : i32
    %23 = tpu.memref_slice %arg2[%22, %c0_i32_13] : memref<50x128xf32, #tpu.memory_space<any>> -> memref<1x128xf32, #tpu.memory_space<any>>
    %c4_i32_14 = arith.constant 4 : i32
    %c0_i32_15 = arith.constant 0 : i32
    %24 = tpu.memref_slice %arg8[%c4_i32_14, %c0_i32_15] : memref<32x128xf32, #tpu.memory_space<vmem>> -> memref<1x128xf32, #tpu.memory_space<vmem>>
    %25 = tpu.memref_slice %arg9[%c4_i32] : memref<32x!tpu.dma_semaphore, #tpu.memory_space<semaphore_mem>> -> memref<1x!tpu.dma_semaphore, #tpu.memory_space<semaphore_mem>>
    %26 = tpu.memref_squeeze %25 : memref<1x!tpu.dma_semaphore, #tpu.memory_space<semaphore_mem>> -> memref<!tpu.dma_semaphore, #tpu.memory_space<semaphore_mem>>
    tpu.enqueue_dma source(%23 : memref<1x128xf32, #tpu.memory_space<any>>) target(%24 : memref<1x128xf32, #tpu.memory_space<vmem>>) target_semaphore(%26 : memref<!tpu.dma_semaphore, #tpu.memory_space<semaphore_mem>>)
    %c5 = arith.constant 5 : index
    %27 = memref.load %arg1[%c5] : memref<25xi32, #tpu.memory_space<smem>>
    %c5_i32 = arith.constant 5 : i32
    %c0_i32_16 = arith.constant 0 : i32
    %28 = tpu.memref_slice %arg2[%27, %c0_i32_16] : memref<50x128xf32, #tpu.memory_space<any>> -> memref<1x128xf32, #tpu.memory_space<any>>
    %c5_i32_17 = arith.constant 5 : i32
    %c0_i32_18 = arith.constant 0 : i32
    %29 = tpu.memref_slice %arg8[%c5_i32_17, %c0_i32_18] : memref<32x128xf32, #tpu.memory_space<vmem>> -> memref<1x128xf32, #tpu.memory_space<vmem>>
    %30 = tpu.memref_slice %arg9[%c5_i32] : memref<32x!tpu.dma_semaphore, #tpu.memory_space<semaphore_mem>> -> memref<1x!tpu.dma_semaphore, #tpu.memory_space<semaphore_mem>>
    %31 = tpu.memref_squeeze %30 : memref<1x!tpu.dma_semaphore, #tpu.memory_space<semaphore_mem>> -> memref<!tpu.dma_semaphore, #tpu.memory_space<semaphore_mem>>
    tpu.enqueue_dma source(%28 : memref<1x128xf32, #tpu.memory_space<any>>) target(%29 : memref<1x128xf32, #tpu.memory_space<vmem>>) target_semaphore(%31 : memref<!tpu.dma_semaphore, #tpu.memory_space<semaphore_mem>>)
    %c6 = arith.constant 6 : index
    %32 = memref.load %arg1[%c6] : memref<25xi32, #tpu.memory_space<smem>>
    %c6_i32 = arith.constant 6 : i32
    %c0_i32_19 = arith.constant 0 : i32
    %33 = tpu.memref_slice %arg2[%32, %c0_i32_19] : memref<50x128xf32, #tpu.memory_space<any>> -> memref<1x128xf32, #tpu.memory_space<any>>
    %c6_i32_20 = arith.constant 6 : i32
    %c0_i32_21 = arith.constant 0 : i32
    %34 = tpu.memref_slice %arg8[%c6_i32_20, %c0_i32_21] : memref<32x128xf32, #tpu.memory_space<vmem>> -> memref<1x128xf32, #tpu.memory_space<vmem>>
    %35 = tpu.memref_slice %arg9[%c6_i32] : memref<32x!tpu.dma_semaphore, #tpu.memory_space<semaphore_mem>> -> memref<1x!tpu.dma_semaphore, #tpu.memory_space<semaphore_mem>>
    %36 = tpu.memref_squeeze %35 : memref<1x!tpu.dma_semaphore, #tpu.memory_space<semaphore_mem>> -> memref<!tpu.dma_semaphore, #tpu.memory_space<semaphore_mem>>
    tpu.enqueue_dma source(%33 : memref<1x128xf32, #tpu.memory_space<any>>) target(%34 : memref<1x128xf32, #tpu.memory_space<vmem>>) target_semaphore(%36 : memref<!tpu.dma_semaphore, #tpu.memory_space<semaphore_mem>>)
    %c7 = arith.constant 7 : index
    %37 = memref.load %arg1[%c7] : memref<25xi32, #tpu.memory_space<smem>>
    %c7_i32 = arith.constant 7 : i32
    %c0_i32_22 = arith.constant 0 : i32
    %38 = tpu.memref_slice %arg2[%37, %c0_i32_22] : memref<50x128xf32, #tpu.memory_space<any>> -> memref<1x128xf32, #tpu.memory_space<any>>
    %c7_i32_23 = arith.constant 7 : i32
    %c0_i32_24 = arith.constant 0 : i32
    %39 = tpu.memref_slice %arg8[%c7_i32_23, %c0_i32_24] : memref<32x128xf32, #tpu.memory_space<vmem>> -> memref<1x128xf32, #tpu.memory_space<vmem>>
    %40 = tpu.memref_slice %arg9[%c7_i32] : memref<32x!tpu.dma_semaphore, #tpu.memory_space<semaphore_mem>> -> memref<1x!tpu.dma_semaphore, #tpu.memory_space<semaphore_mem>>
    %41 = tpu.memref_squeeze %40 : memref<1x!tpu.dma_semaphore, #tpu.memory_space<semaphore_mem>> -> memref<!tpu.dma_semaphore, #tpu.memory_space<semaphore_mem>>
    tpu.enqueue_dma source(%38 : memref<1x128xf32, #tpu.memory_space<any>>) target(%39 : memref<1x128xf32, #tpu.memory_space<vmem>>) target_semaphore(%41 : memref<!tpu.dma_semaphore, #tpu.memory_space<semaphore_mem>>)
    %c8 = arith.constant 8 : index
    %42 = memref.load %arg1[%c8] : memref<25xi32, #tpu.memory_space<smem>>
    %c8_i32 = arith.constant 8 : i32
    %c0_i32_25 = arith.constant 0 : i32
    %43 = tpu.memref_slice %arg2[%42, %c0_i32_25] : memref<50x128xf32, #tpu.memory_space<any>> -> memref<1x128xf32, #tpu.memory_space<any>>
    %c8_i32_26 = arith.constant 8 : i32
    %c0_i32_27 = arith.constant 0 : i32
    %44 = tpu.memref_slice %arg8[%c8_i32_26, %c0_i32_27] : memref<32x128xf32, #tpu.memory_space<vmem>> -> memref<1x128xf32, #tpu.memory_space<vmem>>
    %45 = tpu.memref_slice %arg9[%c8_i32] : memref<32x!tpu.dma_semaphore, #tpu.memory_space<semaphore_mem>> -> memref<1x!tpu.dma_semaphore, #tpu.memory_space<semaphore_mem>>
    %46 = tpu.memref_squeeze %45 : memref<1x!tpu.dma_semaphore, #tpu.memory_space<semaphore_mem>> -> memref<!tpu.dma_semaphore, #tpu.memory_space<semaphore_mem>>
    tpu.enqueue_dma source(%43 : memref<1x128xf32, #tpu.memory_space<any>>) target(%44 : memref<1x128xf32, #tpu.memory_space<vmem>>) target_semaphore(%46 : memref<!tpu.dma_semaphore, #tpu.memory_space<semaphore_mem>>)
    %c9 = arith.constant 9 : index
    %47 = memref.load %arg1[%c9] : memref<25xi32, #tpu.memory_space<smem>>
    %c9_i32 = arith.constant 9 : i32
    %c0_i32_28 = arith.constant 0 : i32
    %48 = tpu.memref_slice %arg2[%47, %c0_i32_28] : memref<50x128xf32, #tpu.memory_space<any>> -> memref<1x128xf32, #tpu.memory_space<any>>
    %c9_i32_29 = arith.constant 9 : i32
    %c0_i32_30 = arith.constant 0 : i32
    %49 = tpu.memref_slice %arg8[%c9_i32_29, %c0_i32_30] : memref<32x128xf32, #tpu.memory_space<vmem>> -> memref<1x128xf32, #tpu.memory_space<vmem>>
    %50 = tpu.memref_slice %arg9[%c9_i32] : memref<32x!tpu.dma_semaphore, #tpu.memory_space<semaphore_mem>> -> memref<1x!tpu.dma_semaphore, #tpu.memory_space<semaphore_mem>>
    %51 = tpu.memref_squeeze %50 : memref<1x!tpu.dma_semaphore, #tpu.memory_space<semaphore_mem>> -> memref<!tpu.dma_semaphore, #tpu.memory_space<semaphore_mem>>
    tpu.enqueue_dma source(%48 : memref<1x128xf32, #tpu.memory_space<any>>) target(%49 : memref<1x128xf32, #tpu.memory_space<vmem>>) target_semaphore(%51 : memref<!tpu.dma_semaphore, #tpu.memory_space<semaphore_mem>>)
    %c10 = arith.constant 10 : index
    %52 = memref.load %arg1[%c10] : memref<25xi32, #tpu.memory_space<smem>>
    %c10_i32 = arith.constant 10 : i32
    %c0_i32_31 = arith.constant 0 : i32
    %53 = tpu.memref_slice %arg2[%52, %c0_i32_31] : memref<50x128xf32, #tpu.memory_space<any>> -> memref<1x128xf32, #tpu.memory_space<any>>
    %c10_i32_32 = arith.constant 10 : i32
    %c0_i32_33 = arith.constant 0 : i32
    %54 = tpu.memref_slice %arg8[%c10_i32_32, %c0_i32_33] : memref<32x128xf32, #tpu.memory_space<vmem>> -> memref<1x128xf32, #tpu.memory_space<vmem>>
    %55 = tpu.memref_slice %arg9[%c10_i32] : memref<32x!tpu.dma_semaphore, #tpu.memory_space<semaphore_mem>> -> memref<1x!tpu.dma_semaphore, #tpu.memory_space<semaphore_mem>>
    %56 = tpu.memref_squeeze %55 : memref<1x!tpu.dma_semaphore, #tpu.memory_space<semaphore_mem>> -> memref<!tpu.dma_semaphore, #tpu.memory_space<semaphore_mem>>
    tpu.enqueue_dma source(%53 : memref<1x128xf32, #tpu.memory_space<any>>) target(%54 : memref<1x128xf32, #tpu.memory_space<vmem>>) target_semaphore(%56 : memref<!tpu.dma_semaphore, #tpu.memory_space<semaphore_mem>>)
    %c11 = arith.constant 11 : index
    %57 = memref.load %arg1[%c11] : memref<25xi32, #tpu.memory_space<smem>>
    %c11_i32 = arith.constant 11 : i32
    %c0_i32_34 = arith.constant 0 : i32
    %58 = tpu.memref_slice %arg2[%57, %c0_i32_34] : memref<50x128xf32, #tpu.memory_space<any>> -> memref<1x128xf32, #tpu.memory_space<any>>
    %c11_i32_35 = arith.constant 11 : i32
    %c0_i32_36 = arith.constant 0 : i32
    %59 = tpu.memref_slice %arg8[%c11_i32_35, %c0_i32_36] : memref<32x128xf32, #tpu.memory_space<vmem>> -> memref<1x128xf32, #tpu.memory_space<vmem>>
    %60 = tpu.memref_slice %arg9[%c11_i32] : memref<32x!tpu.dma_semaphore, #tpu.memory_space<semaphore_mem>> -> memref<1x!tpu.dma_semaphore, #tpu.memory_space<semaphore_mem>>
    %61 = tpu.memref_squeeze %60 : memref<1x!tpu.dma_semaphore, #tpu.memory_space<semaphore_mem>> -> memref<!tpu.dma_semaphore, #tpu.memory_space<semaphore_mem>>
    tpu.enqueue_dma source(%58 : memref<1x128xf32, #tpu.memory_space<any>>) target(%59 : memref<1x128xf32, #tpu.memory_space<vmem>>) target_semaphore(%61 : memref<!tpu.dma_semaphore, #tpu.memory_space<semaphore_mem>>)
    %c12 = arith.constant 12 : index
    %62 = memref.load %arg1[%c12] : memref<25xi32, #tpu.memory_space<smem>>
    %c12_i32 = arith.constant 12 : i32
    %c0_i32_37 = arith.constant 0 : i32
    %63 = tpu.memref_slice %arg2[%62, %c0_i32_37] : memref<50x128xf32, #tpu.memory_space<any>> -> memref<1x128xf32, #tpu.memory_space<any>>
    %c12_i32_38 = arith.constant 12 : i32
    %c0_i32_39 = arith.constant 0 : i32
    %64 = tpu.memref_slice %arg8[%c12_i32_38, %c0_i32_39] : memref<32x128xf32, #tpu.memory_space<vmem>> -> memref<1x128xf32, #tpu.memory_space<vmem>>
    %65 = tpu.memref_slice %arg9[%c12_i32] : memref<32x!tpu.dma_semaphore, #tpu.memory_space<semaphore_mem>> -> memref<1x!tpu.dma_semaphore, #tpu.memory_space<semaphore_mem>>
    %66 = tpu.memref_squeeze %65 : memref<1x!tpu.dma_semaphore, #tpu.memory_space<semaphore_mem>> -> memref<!tpu.dma_semaphore, #tpu.memory_space<semaphore_mem>>
    tpu.enqueue_dma source(%63 : memref<1x128xf32, #tpu.memory_space<any>>) target(%64 : memref<1x128xf32, #tpu.memory_space<vmem>>) target_semaphore(%66 : memref<!tpu.dma_semaphore, #tpu.memory_space<semaphore_mem>>)
    %c13 = arith.constant 13 : index
    %67 = memref.load %arg1[%c13] : memref<25xi32, #tpu.memory_space<smem>>
    %c13_i32 = arith.constant 13 : i32
    %c0_i32_40 = arith.constant 0 : i32
    %68 = tpu.memref_slice %arg2[%67, %c0_i32_40] : memref<50x128xf32, #tpu.memory_space<any>> -> memref<1x128xf32, #tpu.memory_space<any>>
    %c13_i32_41 = arith.constant 13 : i32
    %c0_i32_42 = arith.constant 0 : i32
    %69 = tpu.memref_slice %arg8[%c13_i32_41, %c0_i32_42] : memref<32x128xf32, #tpu.memory_space<vmem>> -> memref<1x128xf32, #tpu.memory_space<vmem>>
    %70 = tpu.memref_slice %arg9[%c13_i32] : memref<32x!tpu.dma_semaphore, #tpu.memory_space<semaphore_mem>> -> memref<1x!tpu.dma_semaphore, #tpu.memory_space<semaphore_mem>>
    %71 = tpu.memref_squeeze %70 : memref<1x!tpu.dma_semaphore, #tpu.memory_space<semaphore_mem>> -> memref<!tpu.dma_semaphore, #tpu.memory_space<semaphore_mem>>
    tpu.enqueue_dma source(%68 : memref<1x128xf32, #tpu.memory_space<any>>) target(%69 : memref<1x128xf32, #tpu.memory_space<vmem>>) target_semaphore(%71 : memref<!tpu.dma_semaphore, #tpu.memory_space<semaphore_mem>>)
    %c14 = arith.constant 14 : index
    %72 = memref.load %arg1[%c14] : memref<25xi32, #tpu.memory_space<smem>>
    %c14_i32 = arith.constant 14 : i32
    %c0_i32_43 = arith.constant 0 : i32
    %73 = tpu.memref_slice %arg2[%72, %c0_i32_43] : memref<50x128xf32, #tpu.memory_space<any>> -> memref<1x128xf32, #tpu.memory_space<any>>
    %c14_i32_44 = arith.constant 14 : i32
    %c0_i32_45 = arith.constant 0 : i32
    %74 = tpu.memref_slice %arg8[%c14_i32_44, %c0_i32_45] : memref<32x128xf32, #tpu.memory_space<vmem>> -> memref<1x128xf32, #tpu.memory_space<vmem>>
    %75 = tpu.memref_slice %arg9[%c14_i32] : memref<32x!tpu.dma_semaphore, #tpu.memory_space<semaphore_mem>> -> memref<1x!tpu.dma_semaphore, #tpu.memory_space<semaphore_mem>>
    %76 = tpu.memref_squeeze %75 : memref<1x!tpu.dma_semaphore, #tpu.memory_space<semaphore_mem>> -> memref<!tpu.dma_semaphore, #tpu.memory_space<semaphore_mem>>
    tpu.enqueue_dma source(%73 : memref<1x128xf32, #tpu.memory_space<any>>) target(%74 : memref<1x128xf32, #tpu.memory_space<vmem>>) target_semaphore(%76 : memref<!tpu.dma_semaphore, #tpu.memory_space<semaphore_mem>>)
    %c15 = arith.constant 15 : index
    %77 = memref.load %arg1[%c15] : memref<25xi32, #tpu.memory_space<smem>>
    %c15_i32 = arith.constant 15 : i32
    %c0_i32_46 = arith.constant 0 : i32
    %78 = tpu.memref_slice %arg2[%77, %c0_i32_46] : memref<50x128xf32, #tpu.memory_space<any>> -> memref<1x128xf32, #tpu.memory_space<any>>
    %c15_i32_47 = arith.constant 15 : i32
    %c0_i32_48 = arith.constant 0 : i32
    %79 = tpu.memref_slice %arg8[%c15_i32_47, %c0_i32_48] : memref<32x128xf32, #tpu.memory_space<vmem>> -> memref<1x128xf32, #tpu.memory_space<vmem>>
    %80 = tpu.memref_slice %arg9[%c15_i32] : memref<32x!tpu.dma_semaphore, #tpu.memory_space<semaphore_mem>> -> memref<1x!tpu.dma_semaphore, #tpu.memory_space<semaphore_mem>>
    %81 = tpu.memref_squeeze %80 : memref<1x!tpu.dma_semaphore, #tpu.memory_space<semaphore_mem>> -> memref<!tpu.dma_semaphore, #tpu.memory_space<semaphore_mem>>
    tpu.enqueue_dma source(%78 : memref<1x128xf32, #tpu.memory_space<any>>) target(%79 : memref<1x128xf32, #tpu.memory_space<vmem>>) target_semaphore(%81 : memref<!tpu.dma_semaphore, #tpu.memory_space<semaphore_mem>>)
    %c16 = arith.constant 16 : index
    %82 = memref.load %arg1[%c16] : memref<25xi32, #tpu.memory_space<smem>>
    %c16_i32 = arith.constant 16 : i32
    %c0_i32_49 = arith.constant 0 : i32
    %83 = tpu.memref_slice %arg2[%82, %c0_i32_49] : memref<50x128xf32, #tpu.memory_space<any>> -> memref<1x128xf32, #tpu.memory_space<any>>
    %c16_i32_50 = arith.constant 16 : i32
    %c0_i32_51 = arith.constant 0 : i32
    %84 = tpu.memref_slice %arg8[%c16_i32_50, %c0_i32_51] : memref<32x128xf32, #tpu.memory_space<vmem>> -> memref<1x128xf32, #tpu.memory_space<vmem>>
    %85 = tpu.memref_slice %arg9[%c16_i32] : memref<32x!tpu.dma_semaphore, #tpu.memory_space<semaphore_mem>> -> memref<1x!tpu.dma_semaphore, #tpu.memory_space<semaphore_mem>>
    %86 = tpu.memref_squeeze %85 : memref<1x!tpu.dma_semaphore, #tpu.memory_space<semaphore_mem>> -> memref<!tpu.dma_semaphore, #tpu.memory_space<semaphore_mem>>
    tpu.enqueue_dma source(%83 : memref<1x128xf32, #tpu.memory_space<any>>) target(%84 : memref<1x128xf32, #tpu.memory_space<vmem>>) target_semaphore(%86 : memref<!tpu.dma_semaphore, #tpu.memory_space<semaphore_mem>>)
    %c17 = arith.constant 17 : index
    %87 = memref.load %arg1[%c17] : memref<25xi32, #tpu.memory_space<smem>>
    %c17_i32 = arith.constant 17 : i32
    %c0_i32_52 = arith.constant 0 : i32
    %88 = tpu.memref_slice %arg2[%87, %c0_i32_52] : memref<50x128xf32, #tpu.memory_space<any>> -> memref<1x128xf32, #tpu.memory_space<any>>
    %c17_i32_53 = arith.constant 17 : i32
    %c0_i32_54 = arith.constant 0 : i32
    %89 = tpu.memref_slice %arg8[%c17_i32_53, %c0_i32_54] : memref<32x128xf32, #tpu.memory_space<vmem>> -> memref<1x128xf32, #tpu.memory_space<vmem>>
    %90 = tpu.memref_slice %arg9[%c17_i32] : memref<32x!tpu.dma_semaphore, #tpu.memory_space<semaphore_mem>> -> memref<1x!tpu.dma_semaphore, #tpu.memory_space<semaphore_mem>>
    %91 = tpu.memref_squeeze %90 : memref<1x!tpu.dma_semaphore, #tpu.memory_space<semaphore_mem>> -> memref<!tpu.dma_semaphore, #tpu.memory_space<semaphore_mem>>
    tpu.enqueue_dma source(%88 : memref<1x128xf32, #tpu.memory_space<any>>) target(%89 : memref<1x128xf32, #tpu.memory_space<vmem>>) target_semaphore(%91 : memref<!tpu.dma_semaphore, #tpu.memory_space<semaphore_mem>>)
    %c18 = arith.constant 18 : index
    %92 = memref.load %arg1[%c18] : memref<25xi32, #tpu.memory_space<smem>>
    %c18_i32 = arith.constant 18 : i32
    %c0_i32_55 = arith.constant 0 : i32
    %93 = tpu.memref_slice %arg2[%92, %c0_i32_55] : memref<50x128xf32, #tpu.memory_space<any>> -> memref<1x128xf32, #tpu.memory_space<any>>
    %c18_i32_56 = arith.constant 18 : i32
    %c0_i32_57 = arith.constant 0 : i32
    %94 = tpu.memref_slice %arg8[%c18_i32_56, %c0_i32_57] : memref<32x128xf32, #tpu.memory_space<vmem>> -> memref<1x128xf32, #tpu.memory_space<vmem>>
    %95 = tpu.memref_slice %arg9[%c18_i32] : memref<32x!tpu.dma_semaphore, #tpu.memory_space<semaphore_mem>> -> memref<1x!tpu.dma_semaphore, #tpu.memory_space<semaphore_mem>>
    %96 = tpu.memref_squeeze %95 : memref<1x!tpu.dma_semaphore, #tpu.memory_space<semaphore_mem>> -> memref<!tpu.dma_semaphore, #tpu.memory_space<semaphore_mem>>
    tpu.enqueue_dma source(%93 : memref<1x128xf32, #tpu.memory_space<any>>) target(%94 : memref<1x128xf32, #tpu.memory_space<vmem>>) target_semaphore(%96 : memref<!tpu.dma_semaphore, #tpu.memory_space<semaphore_mem>>)
    %c19 = arith.constant 19 : index
    %97 = memref.load %arg1[%c19] : memref<25xi32, #tpu.memory_space<smem>>
    %c19_i32 = arith.constant 19 : i32
    %c0_i32_58 = arith.constant 0 : i32
    %98 = tpu.memref_slice %arg2[%97, %c0_i32_58] : memref<50x128xf32, #tpu.memory_space<any>> -> memref<1x128xf32, #tpu.memory_space<any>>
    %c19_i32_59 = arith.constant 19 : i32
    %c0_i32_60 = arith.constant 0 : i32
    %99 = tpu.memref_slice %arg8[%c19_i32_59, %c0_i32_60] : memref<32x128xf32, #tpu.memory_space<vmem>> -> memref<1x128xf32, #tpu.memory_space<vmem>>
    %100 = tpu.memref_slice %arg9[%c19_i32] : memref<32x!tpu.dma_semaphore, #tpu.memory_space<semaphore_mem>> -> memref<1x!tpu.dma_semaphore, #tpu.memory_space<semaphore_mem>>
    %101 = tpu.memref_squeeze %100 : memref<1x!tpu.dma_semaphore, #tpu.memory_space<semaphore_mem>> -> memref<!tpu.dma_semaphore, #tpu.memory_space<semaphore_mem>>
    tpu.enqueue_dma source(%98 : memref<1x128xf32, #tpu.memory_space<any>>) target(%99 : memref<1x128xf32, #tpu.memory_space<vmem>>) target_semaphore(%101 : memref<!tpu.dma_semaphore, #tpu.memory_space<semaphore_mem>>)
    %c20 = arith.constant 20 : index
    %102 = memref.load %arg1[%c20] : memref<25xi32, #tpu.memory_space<smem>>
    %c20_i32 = arith.constant 20 : i32
    %c0_i32_61 = arith.constant 0 : i32
    %103 = tpu.memref_slice %arg2[%102, %c0_i32_61] : memref<50x128xf32, #tpu.memory_space<any>> -> memref<1x128xf32, #tpu.memory_space<any>>
    %c20_i32_62 = arith.constant 20 : i32
    %c0_i32_63 = arith.constant 0 : i32
    %104 = tpu.memref_slice %arg8[%c20_i32_62, %c0_i32_63] : memref<32x128xf32, #tpu.memory_space<vmem>> -> memref<1x128xf32, #tpu.memory_space<vmem>>
    %105 = tpu.memref_slice %arg9[%c20_i32] : memref<32x!tpu.dma_semaphore, #tpu.memory_space<semaphore_mem>> -> memref<1x!tpu.dma_semaphore, #tpu.memory_space<semaphore_mem>>
    %106 = tpu.memref_squeeze %105 : memref<1x!tpu.dma_semaphore, #tpu.memory_space<semaphore_mem>> -> memref<!tpu.dma_semaphore, #tpu.memory_space<semaphore_mem>>
    tpu.enqueue_dma source(%103 : memref<1x128xf32, #tpu.memory_space<any>>) target(%104 : memref<1x128xf32, #tpu.memory_space<vmem>>) target_semaphore(%106 : memref<!tpu.dma_semaphore, #tpu.memory_space<semaphore_mem>>)
    %c21 = arith.constant 21 : index
    %107 = memref.load %arg1[%c21] : memref<25xi32, #tpu.memory_space<smem>>
    %c21_i32 = arith.constant 21 : i32
    %c0_i32_64 = arith.constant 0 : i32
    %108 = tpu.memref_slice %arg2[%107, %c0_i32_64] : memref<50x128xf32, #tpu.memory_space<any>> -> memref<1x128xf32, #tpu.memory_space<any>>
    %c21_i32_65 = arith.constant 21 : i32
    %c0_i32_66 = arith.constant 0 : i32
    %109 = tpu.memref_slice %arg8[%c21_i32_65, %c0_i32_66] : memref<32x128xf32, #tpu.memory_space<vmem>> -> memref<1x128xf32, #tpu.memory_space<vmem>>
    %110 = tpu.memref_slice %arg9[%c21_i32] : memref<32x!tpu.dma_semaphore, #tpu.memory_space<semaphore_mem>> -> memref<1x!tpu.dma_semaphore, #tpu.memory_space<semaphore_mem>>
    %111 = tpu.memref_squeeze %110 : memref<1x!tpu.dma_semaphore, #tpu.memory_space<semaphore_mem>> -> memref<!tpu.dma_semaphore, #tpu.memory_space<semaphore_mem>>
    tpu.enqueue_dma source(%108 : memref<1x128xf32, #tpu.memory_space<any>>) target(%109 : memref<1x128xf32, #tpu.memory_space<vmem>>) target_semaphore(%111 : memref<!tpu.dma_semaphore, #tpu.memory_space<semaphore_mem>>)
    %c22 = arith.constant 22 : index
    %112 = memref.load %arg1[%c22] : memref<25xi32, #tpu.memory_space<smem>>
    %c22_i32 = arith.constant 22 : i32
    %c0_i32_67 = arith.constant 0 : i32
    %113 = tpu.memref_slice %arg2[%112, %c0_i32_67] : memref<50x128xf32, #tpu.memory_space<any>> -> memref<1x128xf32, #tpu.memory_space<any>>
    %c22_i32_68 = arith.constant 22 : i32
    %c0_i32_69 = arith.constant 0 : i32
    %114 = tpu.memref_slice %arg8[%c22_i32_68, %c0_i32_69] : memref<32x128xf32, #tpu.memory_space<vmem>> -> memref<1x128xf32, #tpu.memory_space<vmem>>
    %115 = tpu.memref_slice %arg9[%c22_i32] : memref<32x!tpu.dma_semaphore, #tpu.memory_space<semaphore_mem>> -> memref<1x!tpu.dma_semaphore, #tpu.memory_space<semaphore_mem>>
    %116 = tpu.memref_squeeze %115 : memref<1x!tpu.dma_semaphore, #tpu.memory_space<semaphore_mem>> -> memref<!tpu.dma_semaphore, #tpu.memory_space<semaphore_mem>>
    tpu.enqueue_dma source(%113 : memref<1x128xf32, #tpu.memory_space<any>>) target(%114 : memref<1x128xf32, #tpu.memory_space<vmem>>) target_semaphore(%116 : memref<!tpu.dma_semaphore, #tpu.memory_space<semaphore_mem>>)
    %c23 = arith.constant 23 : index
    %117 = memref.load %arg1[%c23] : memref<25xi32, #tpu.memory_space<smem>>
    %c23_i32 = arith.constant 23 : i32
    %c0_i32_70 = arith.constant 0 : i32
    %118 = tpu.memref_slice %arg2[%117, %c0_i32_70] : memref<50x128xf32, #tpu.memory_space<any>> -> memref<1x128xf32, #tpu.memory_space<any>>
    %c23_i32_71 = arith.constant 23 : i32
    %c0_i32_72 = arith.constant 0 : i32
    %119 = tpu.memref_slice %arg8[%c23_i32_71, %c0_i32_72] : memref<32x128xf32, #tpu.memory_space<vmem>> -> memref<1x128xf32, #tpu.memory_space<vmem>>
    %120 = tpu.memref_slice %arg9[%c23_i32] : memref<32x!tpu.dma_semaphore, #tpu.memory_space<semaphore_mem>> -> memref<1x!tpu.dma_semaphore, #tpu.memory_space<semaphore_mem>>
    %121 = tpu.memref_squeeze %120 : memref<1x!tpu.dma_semaphore, #tpu.memory_space<semaphore_mem>> -> memref<!tpu.dma_semaphore, #tpu.memory_space<semaphore_mem>>
    tpu.enqueue_dma source(%118 : memref<1x128xf32, #tpu.memory_space<any>>) target(%119 : memref<1x128xf32, #tpu.memory_space<vmem>>) target_semaphore(%121 : memref<!tpu.dma_semaphore, #tpu.memory_space<semaphore_mem>>)
    %c24 = arith.constant 24 : index
    %122 = memref.load %arg1[%c24] : memref<25xi32, #tpu.memory_space<smem>>
    %c24_i32 = arith.constant 24 : i32
    %c0_i32_73 = arith.constant 0 : i32
    %123 = tpu.memref_slice %arg2[%122, %c0_i32_73] : memref<50x128xf32, #tpu.memory_space<any>> -> memref<1x128xf32, #tpu.memory_space<any>>
    %c24_i32_74 = arith.constant 24 : i32
    %c0_i32_75 = arith.constant 0 : i32
    %124 = tpu.memref_slice %arg8[%c24_i32_74, %c0_i32_75] : memref<32x128xf32, #tpu.memory_space<vmem>> -> memref<1x128xf32, #tpu.memory_space<vmem>>
    %125 = tpu.memref_slice %arg9[%c24_i32] : memref<32x!tpu.dma_semaphore, #tpu.memory_space<semaphore_mem>> -> memref<1x!tpu.dma_semaphore, #tpu.memory_space<semaphore_mem>>
    %126 = tpu.memref_squeeze %125 : memref<1x!tpu.dma_semaphore, #tpu.memory_space<semaphore_mem>> -> memref<!tpu.dma_semaphore, #tpu.memory_space<semaphore_mem>>
    tpu.enqueue_dma source(%123 : memref<1x128xf32, #tpu.memory_space<any>>) target(%124 : memref<1x128xf32, #tpu.memory_space<vmem>>) target_semaphore(%126 : memref<!tpu.dma_semaphore, #tpu.memory_space<semaphore_mem>>)
    %c0_i32_76 = arith.constant 0 : i32
    %c0_i32_77 = arith.constant 0 : i32
    %c0_i32_78 = arith.constant 0 : i32
    %127 = tpu.memref_slice %arg2[%c0_i32_77, %c0_i32_78] : memref<50x128xf32, #tpu.memory_space<any>> -> memref<1x128xf32, #tpu.memory_space<any>>
    %c0_i32_79 = arith.constant 0 : i32
    %c0_i32_80 = arith.constant 0 : i32
    %128 = tpu.memref_slice %arg8[%c0_i32_79, %c0_i32_80] : memref<32x128xf32, #tpu.memory_space<vmem>> -> memref<1x128xf32, #tpu.memory_space<vmem>>
    %129 = tpu.memref_slice %arg9[%c0_i32_76] : memref<32x!tpu.dma_semaphore, #tpu.memory_space<semaphore_mem>> -> memref<1x!tpu.dma_semaphore, #tpu.memory_space<semaphore_mem>>
    %130 = tpu.memref_squeeze %129 : memref<1x!tpu.dma_semaphore, #tpu.memory_space<semaphore_mem>> -> memref<!tpu.dma_semaphore, #tpu.memory_space<semaphore_mem>>
    tpu.wait_dma2 semaphore(%130 : memref<!tpu.dma_semaphore, #tpu.memory_space<semaphore_mem>>) src(%127 : memref<1x128xf32, #tpu.memory_space<any>>) dst(%128 : memref<1x128xf32, #tpu.memory_space<vmem>>)
    %c1_i32_81 = arith.constant 1 : i32
    %c0_i32_82 = arith.constant 0 : i32
    %c0_i32_83 = arith.constant 0 : i32
    %131 = tpu.memref_slice %arg2[%c0_i32_82, %c0_i32_83] : memref<50x128xf32, #tpu.memory_space<any>> -> memref<1x128xf32, #tpu.memory_space<any>>
    %c1_i32_84 = arith.constant 1 : i32
    %c0_i32_85 = arith.constant 0 : i32
    %132 = tpu.memref_slice %arg8[%c1_i32_84, %c0_i32_85] : memref<32x128xf32, #tpu.memory_space<vmem>> -> memref<1x128xf32, #tpu.memory_space<vmem>>
    %133 = tpu.memref_slice %arg9[%c1_i32_81] : memref<32x!tpu.dma_semaphore, #tpu.memory_space<semaphore_mem>> -> memref<1x!tpu.dma_semaphore, #tpu.memory_space<semaphore_mem>>
    %134 = tpu.memref_squeeze %133 : memref<1x!tpu.dma_semaphore, #tpu.memory_space<semaphore_mem>> -> memref<!tpu.dma_semaphore, #tpu.memory_space<semaphore_mem>>
    tpu.wait_dma2 semaphore(%134 : memref<!tpu.dma_semaphore, #tpu.memory_space<semaphore_mem>>) src(%131 : memref<1x128xf32, #tpu.memory_space<any>>) dst(%132 : memref<1x128xf32, #tpu.memory_space<vmem>>)
    %c2_i32_86 = arith.constant 2 : i32
    %c0_i32_87 = arith.constant 0 : i32
    %c0_i32_88 = arith.constant 0 : i32
    %135 = tpu.memref_slice %arg2[%c0_i32_87, %c0_i32_88] : memref<50x128xf32, #tpu.memory_space<any>> -> memref<1x128xf32, #tpu.memory_space<any>>
    %c2_i32_89 = arith.constant 2 : i32
    %c0_i32_90 = arith.constant 0 : i32
    %136 = tpu.memref_slice %arg8[%c2_i32_89, %c0_i32_90] : memref<32x128xf32, #tpu.memory_space<vmem>> -> memref<1x128xf32, #tpu.memory_space<vmem>>
    %137 = tpu.memref_slice %arg9[%c2_i32_86] : memref<32x!tpu.dma_semaphore, #tpu.memory_space<semaphore_mem>> -> memref<1x!tpu.dma_semaphore, #tpu.memory_space<semaphore_mem>>
    %138 = tpu.memref_squeeze %137 : memref<1x!tpu.dma_semaphore, #tpu.memory_space<semaphore_mem>> -> memref<!tpu.dma_semaphore, #tpu.memory_space<semaphore_mem>>
    tpu.wait_dma2 semaphore(%138 : memref<!tpu.dma_semaphore, #tpu.memory_space<semaphore_mem>>) src(%135 : memref<1x128xf32, #tpu.memory_space<any>>) dst(%136 : memref<1x128xf32, #tpu.memory_space<vmem>>)
    %c3_i32_91 = arith.constant 3 : i32
    %c0_i32_92 = arith.constant 0 : i32
    %c0_i32_93 = arith.constant 0 : i32
    %139 = tpu.memref_slice %arg2[%c0_i32_92, %c0_i32_93] : memref<50x128xf32, #tpu.memory_space<any>> -> memref<1x128xf32, #tpu.memory_space<any>>
    %c3_i32_94 = arith.constant 3 : i32
    %c0_i32_95 = arith.constant 0 : i32
    %140 = tpu.memref_slice %arg8[%c3_i32_94, %c0_i32_95] : memref<32x128xf32, #tpu.memory_space<vmem>> -> memref<1x128xf32, #tpu.memory_space<vmem>>
    %141 = tpu.memref_slice %arg9[%c3_i32_91] : memref<32x!tpu.dma_semaphore, #tpu.memory_space<semaphore_mem>> -> memref<1x!tpu.dma_semaphore, #tpu.memory_space<semaphore_mem>>
    %142 = tpu.memref_squeeze %141 : memref<1x!tpu.dma_semaphore, #tpu.memory_space<semaphore_mem>> -> memref<!tpu.dma_semaphore, #tpu.memory_space<semaphore_mem>>
    tpu.wait_dma2 semaphore(%142 : memref<!tpu.dma_semaphore, #tpu.memory_space<semaphore_mem>>) src(%139 : memref<1x128xf32, #tpu.memory_space<any>>) dst(%140 : memref<1x128xf32, #tpu.memory_space<vmem>>)
    %c4_i32_96 = arith.constant 4 : i32
    %c0_i32_97 = arith.constant 0 : i32
    %c0_i32_98 = arith.constant 0 : i32
    %143 = tpu.memref_slice %arg2[%c0_i32_97, %c0_i32_98] : memref<50x128xf32, #tpu.memory_space<any>> -> memref<1x128xf32, #tpu.memory_space<any>>
    %c4_i32_99 = arith.constant 4 : i32
    %c0_i32_100 = arith.constant 0 : i32
    %144 = tpu.memref_slice %arg8[%c4_i32_99, %c0_i32_100] : memref<32x128xf32, #tpu.memory_space<vmem>> -> memref<1x128xf32, #tpu.memory_space<vmem>>
    %145 = tpu.memref_slice %arg9[%c4_i32_96] : memref<32x!tpu.dma_semaphore, #tpu.memory_space<semaphore_mem>> -> memref<1x!tpu.dma_semaphore, #tpu.memory_space<semaphore_mem>>
    %146 = tpu.memref_squeeze %145 : memref<1x!tpu.dma_semaphore, #tpu.memory_space<semaphore_mem>> -> memref<!tpu.dma_semaphore, #tpu.memory_space<semaphore_mem>>
    tpu.wait_dma2 semaphore(%146 : memref<!tpu.dma_semaphore, #tpu.memory_space<semaphore_mem>>) src(%143 : memref<1x128xf32, #tpu.memory_space<any>>) dst(%144 : memref<1x128xf32, #tpu.memory_space<vmem>>)
    %c5_i32_101 = arith.constant 5 : i32
    %c0_i32_102 = arith.constant 0 : i32
    %c0_i32_103 = arith.constant 0 : i32
    %147 = tpu.memref_slice %arg2[%c0_i32_102, %c0_i32_103] : memref<50x128xf32, #tpu.memory_space<any>> -> memref<1x128xf32, #tpu.memory_space<any>>
    %c5_i32_104 = arith.constant 5 : i32
    %c0_i32_105 = arith.constant 0 : i32
    %148 = tpu.memref_slice %arg8[%c5_i32_104, %c0_i32_105] : memref<32x128xf32, #tpu.memory_space<vmem>> -> memref<1x128xf32, #tpu.memory_space<vmem>>
    %149 = tpu.memref_slice %arg9[%c5_i32_101] : memref<32x!tpu.dma_semaphore, #tpu.memory_space<semaphore_mem>> -> memref<1x!tpu.dma_semaphore, #tpu.memory_space<semaphore_mem>>
    %150 = tpu.memref_squeeze %149 : memref<1x!tpu.dma_semaphore, #tpu.memory_space<semaphore_mem>> -> memref<!tpu.dma_semaphore, #tpu.memory_space<semaphore_mem>>
    tpu.wait_dma2 semaphore(%150 : memref<!tpu.dma_semaphore, #tpu.memory_space<semaphore_mem>>) src(%147 : memref<1x128xf32, #tpu.memory_space<any>>) dst(%148 : memref<1x128xf32, #tpu.memory_space<vmem>>)
    %c6_i32_106 = arith.constant 6 : i32
    %c0_i32_107 = arith.constant 0 : i32
    %c0_i32_108 = arith.constant 0 : i32
    %151 = tpu.memref_slice %arg2[%c0_i32_107, %c0_i32_108] : memref<50x128xf32, #tpu.memory_space<any>> -> memref<1x128xf32, #tpu.memory_space<any>>
    %c6_i32_109 = arith.constant 6 : i32
    %c0_i32_110 = arith.constant 0 : i32
    %152 = tpu.memref_slice %arg8[%c6_i32_109, %c0_i32_110] : memref<32x128xf32, #tpu.memory_space<vmem>> -> memref<1x128xf32, #tpu.memory_space<vmem>>
    %153 = tpu.memref_slice %arg9[%c6_i32_106] : memref<32x!tpu.dma_semaphore, #tpu.memory_space<semaphore_mem>> -> memref<1x!tpu.dma_semaphore, #tpu.memory_space<semaphore_mem>>
    %154 = tpu.memref_squeeze %153 : memref<1x!tpu.dma_semaphore, #tpu.memory_space<semaphore_mem>> -> memref<!tpu.dma_semaphore, #tpu.memory_space<semaphore_mem>>
    tpu.wait_dma2 semaphore(%154 : memref<!tpu.dma_semaphore, #tpu.memory_space<semaphore_mem>>) src(%151 : memref<1x128xf32, #tpu.memory_space<any>>) dst(%152 : memref<1x128xf32, #tpu.memory_space<vmem>>)
    %c7_i32_111 = arith.constant 7 : i32
    %c0_i32_112 = arith.constant 0 : i32
    %c0_i32_113 = arith.constant 0 : i32
    %155 = tpu.memref_slice %arg2[%c0_i32_112, %c0_i32_113] : memref<50x128xf32, #tpu.memory_space<any>> -> memref<1x128xf32, #tpu.memory_space<any>>
    %c7_i32_114 = arith.constant 7 : i32
    %c0_i32_115 = arith.constant 0 : i32
    %156 = tpu.memref_slice %arg8[%c7_i32_114, %c0_i32_115] : memref<32x128xf32, #tpu.memory_space<vmem>> -> memref<1x128xf32, #tpu.memory_space<vmem>>
    %157 = tpu.memref_slice %arg9[%c7_i32_111] : memref<32x!tpu.dma_semaphore, #tpu.memory_space<semaphore_mem>> -> memref<1x!tpu.dma_semaphore, #tpu.memory_space<semaphore_mem>>
    %158 = tpu.memref_squeeze %157 : memref<1x!tpu.dma_semaphore, #tpu.memory_space<semaphore_mem>> -> memref<!tpu.dma_semaphore, #tpu.memory_space<semaphore_mem>>
    tpu.wait_dma2 semaphore(%158 : memref<!tpu.dma_semaphore, #tpu.memory_space<semaphore_mem>>) src(%155 : memref<1x128xf32, #tpu.memory_space<any>>) dst(%156 : memref<1x128xf32, #tpu.memory_space<vmem>>)
    %c8_i32_116 = arith.constant 8 : i32
    %c0_i32_117 = arith.constant 0 : i32
    %c0_i32_118 = arith.constant 0 : i32
    %159 = tpu.memref_slice %arg2[%c0_i32_117, %c0_i32_118] : memref<50x128xf32, #tpu.memory_space<any>> -> memref<1x128xf32, #tpu.memory_space<any>>
    %c8_i32_119 = arith.constant 8 : i32
    %c0_i32_120 = arith.constant 0 : i32
    %160 = tpu.memref_slice %arg8[%c8_i32_119, %c0_i32_120] : memref<32x128xf32, #tpu.memory_space<vmem>> -> memref<1x128xf32, #tpu.memory_space<vmem>>
    %161 = tpu.memref_slice %arg9[%c8_i32_116] : memref<32x!tpu.dma_semaphore, #tpu.memory_space<semaphore_mem>> -> memref<1x!tpu.dma_semaphore, #tpu.memory_space<semaphore_mem>>
    %162 = tpu.memref_squeeze %161 : memref<1x!tpu.dma_semaphore, #tpu.memory_space<semaphore_mem>> -> memref<!tpu.dma_semaphore, #tpu.memory_space<semaphore_mem>>
    tpu.wait_dma2 semaphore(%162 : memref<!tpu.dma_semaphore, #tpu.memory_space<semaphore_mem>>) src(%159 : memref<1x128xf32, #tpu.memory_space<any>>) dst(%160 : memref<1x128xf32, #tpu.memory_space<vmem>>)
    %c9_i32_121 = arith.constant 9 : i32
    %c0_i32_122 = arith.constant 0 : i32
    %c0_i32_123 = arith.constant 0 : i32
    %163 = tpu.memref_slice %arg2[%c0_i32_122, %c0_i32_123] : memref<50x128xf32, #tpu.memory_space<any>> -> memref<1x128xf32, #tpu.memory_space<any>>
    %c9_i32_124 = arith.constant 9 : i32
    %c0_i32_125 = arith.constant 0 : i32
    %164 = tpu.memref_slice %arg8[%c9_i32_124, %c0_i32_125] : memref<32x128xf32, #tpu.memory_space<vmem>> -> memref<1x128xf32, #tpu.memory_space<vmem>>
    %165 = tpu.memref_slice %arg9[%c9_i32_121] : memref<32x!tpu.dma_semaphore, #tpu.memory_space<semaphore_mem>> -> memref<1x!tpu.dma_semaphore, #tpu.memory_space<semaphore_mem>>
    %166 = tpu.memref_squeeze %165 : memref<1x!tpu.dma_semaphore, #tpu.memory_space<semaphore_mem>> -> memref<!tpu.dma_semaphore, #tpu.memory_space<semaphore_mem>>
    tpu.wait_dma2 semaphore(%166 : memref<!tpu.dma_semaphore, #tpu.memory_space<semaphore_mem>>) src(%163 : memref<1x128xf32, #tpu.memory_space<any>>) dst(%164 : memref<1x128xf32, #tpu.memory_space<vmem>>)
    %c10_i32_126 = arith.constant 10 : i32
    %c0_i32_127 = arith.constant 0 : i32
    %c0_i32_128 = arith.constant 0 : i32
    %167 = tpu.memref_slice %arg2[%c0_i32_127, %c0_i32_128] : memref<50x128xf32, #tpu.memory_space<any>> -> memref<1x128xf32, #tpu.memory_space<any>>
    %c10_i32_129 = arith.constant 10 : i32
    %c0_i32_130 = arith.constant 0 : i32
    %168 = tpu.memref_slice %arg8[%c10_i32_129, %c0_i32_130] : memref<32x128xf32, #tpu.memory_space<vmem>> -> memref<1x128xf32, #tpu.memory_space<vmem>>
    %169 = tpu.memref_slice %arg9[%c10_i32_126] : memref<32x!tpu.dma_semaphore, #tpu.memory_space<semaphore_mem>> -> memref<1x!tpu.dma_semaphore, #tpu.memory_space<semaphore_mem>>
    %170 = tpu.memref_squeeze %169 : memref<1x!tpu.dma_semaphore, #tpu.memory_space<semaphore_mem>> -> memref<!tpu.dma_semaphore, #tpu.memory_space<semaphore_mem>>
    tpu.wait_dma2 semaphore(%170 : memref<!tpu.dma_semaphore, #tpu.memory_space<semaphore_mem>>) src(%167 : memref<1x128xf32, #tpu.memory_space<any>>) dst(%168 : memref<1x128xf32, #tpu.memory_space<vmem>>)
    %c11_i32_131 = arith.constant 11 : i32
    %c0_i32_132 = arith.constant 0 : i32
    %c0_i32_133 = arith.constant 0 : i32
    %171 = tpu.memref_slice %arg2[%c0_i32_132, %c0_i32_133] : memref<50x128xf32, #tpu.memory_space<any>> -> memref<1x128xf32, #tpu.memory_space<any>>
    %c11_i32_134 = arith.constant 11 : i32
    %c0_i32_135 = arith.constant 0 : i32
    %172 = tpu.memref_slice %arg8[%c11_i32_134, %c0_i32_135] : memref<32x128xf32, #tpu.memory_space<vmem>> -> memref<1x128xf32, #tpu.memory_space<vmem>>
    %173 = tpu.memref_slice %arg9[%c11_i32_131] : memref<32x!tpu.dma_semaphore, #tpu.memory_space<semaphore_mem>> -> memref<1x!tpu.dma_semaphore, #tpu.memory_space<semaphore_mem>>
    %174 = tpu.memref_squeeze %173 : memref<1x!tpu.dma_semaphore, #tpu.memory_space<semaphore_mem>> -> memref<!tpu.dma_semaphore, #tpu.memory_space<semaphore_mem>>
    tpu.wait_dma2 semaphore(%174 : memref<!tpu.dma_semaphore, #tpu.memory_space<semaphore_mem>>) src(%171 : memref<1x128xf32, #tpu.memory_space<any>>) dst(%172 : memref<1x128xf32, #tpu.memory_space<vmem>>)
    %c12_i32_136 = arith.constant 12 : i32
    %c0_i32_137 = arith.constant 0 : i32
    %c0_i32_138 = arith.constant 0 : i32
    %175 = tpu.memref_slice %arg2[%c0_i32_137, %c0_i32_138] : memref<50x128xf32, #tpu.memory_space<any>> -> memref<1x128xf32, #tpu.memory_space<any>>
    %c12_i32_139 = arith.constant 12 : i32
    %c0_i32_140 = arith.constant 0 : i32
    %176 = tpu.memref_slice %arg8[%c12_i32_139, %c0_i32_140] : memref<32x128xf32, #tpu.memory_space<vmem>> -> memref<1x128xf32, #tpu.memory_space<vmem>>
    %177 = tpu.memref_slice %arg9[%c12_i32_136] : memref<32x!tpu.dma_semaphore, #tpu.memory_space<semaphore_mem>> -> memref<1x!tpu.dma_semaphore, #tpu.memory_space<semaphore_mem>>
    %178 = tpu.memref_squeeze %177 : memref<1x!tpu.dma_semaphore, #tpu.memory_space<semaphore_mem>> -> memref<!tpu.dma_semaphore, #tpu.memory_space<semaphore_mem>>
    tpu.wait_dma2 semaphore(%178 : memref<!tpu.dma_semaphore, #tpu.memory_space<semaphore_mem>>) src(%175 : memref<1x128xf32, #tpu.memory_space<any>>) dst(%176 : memref<1x128xf32, #tpu.memory_space<vmem>>)
    %c13_i32_141 = arith.constant 13 : i32
    %c0_i32_142 = arith.constant 0 : i32
    %c0_i32_143 = arith.constant 0 : i32
    %179 = tpu.memref_slice %arg2[%c0_i32_142, %c0_i32_143] : memref<50x128xf32, #tpu.memory_space<any>> -> memref<1x128xf32, #tpu.memory_space<any>>
    %c13_i32_144 = arith.constant 13 : i32
    %c0_i32_145 = arith.constant 0 : i32
    %180 = tpu.memref_slice %arg8[%c13_i32_144, %c0_i32_145] : memref<32x128xf32, #tpu.memory_space<vmem>> -> memref<1x128xf32, #tpu.memory_space<vmem>>
    %181 = tpu.memref_slice %arg9[%c13_i32_141] : memref<32x!tpu.dma_semaphore, #tpu.memory_space<semaphore_mem>> -> memref<1x!tpu.dma_semaphore, #tpu.memory_space<semaphore_mem>>
    %182 = tpu.memref_squeeze %181 : memref<1x!tpu.dma_semaphore, #tpu.memory_space<semaphore_mem>> -> memref<!tpu.dma_semaphore, #tpu.memory_space<semaphore_mem>>
    tpu.wait_dma2 semaphore(%182 : memref<!tpu.dma_semaphore, #tpu.memory_space<semaphore_mem>>) src(%179 : memref<1x128xf32, #tpu.memory_space<any>>) dst(%180 : memref<1x128xf32, #tpu.memory_space<vmem>>)
    %c14_i32_146 = arith.constant 14 : i32
    %c0_i32_147 = arith.constant 0 : i32
    %c0_i32_148 = arith.constant 0 : i32
    %183 = tpu.memref_slice %arg2[%c0_i32_147, %c0_i32_148] : memref<50x128xf32, #tpu.memory_space<any>> -> memref<1x128xf32, #tpu.memory_space<any>>
    %c14_i32_149 = arith.constant 14 : i32
    %c0_i32_150 = arith.constant 0 : i32
    %184 = tpu.memref_slice %arg8[%c14_i32_149, %c0_i32_150] : memref<32x128xf32, #tpu.memory_space<vmem>> -> memref<1x128xf32, #tpu.memory_space<vmem>>
    %185 = tpu.memref_slice %arg9[%c14_i32_146] : memref<32x!tpu.dma_semaphore, #tpu.memory_space<semaphore_mem>> -> memref<1x!tpu.dma_semaphore, #tpu.memory_space<semaphore_mem>>
    %186 = tpu.memref_squeeze %185 : memref<1x!tpu.dma_semaphore, #tpu.memory_space<semaphore_mem>> -> memref<!tpu.dma_semaphore, #tpu.memory_space<semaphore_mem>>
    tpu.wait_dma2 semaphore(%186 : memref<!tpu.dma_semaphore, #tpu.memory_space<semaphore_mem>>) src(%183 : memref<1x128xf32, #tpu.memory_space<any>>) dst(%184 : memref<1x128xf32, #tpu.memory_space<vmem>>)
    %c15_i32_151 = arith.constant 15 : i32
    %c0_i32_152 = arith.constant 0 : i32
    %c0_i32_153 = arith.constant 0 : i32
    %187 = tpu.memref_slice %arg2[%c0_i32_152, %c0_i32_153] : memref<50x128xf32, #tpu.memory_space<any>> -> memref<1x128xf32, #tpu.memory_space<any>>
    %c15_i32_154 = arith.constant 15 : i32
    %c0_i32_155 = arith.constant 0 : i32
    %188 = tpu.memref_slice %arg8[%c15_i32_154, %c0_i32_155] : memref<32x128xf32, #tpu.memory_space<vmem>> -> memref<1x128xf32, #tpu.memory_space<vmem>>
    %189 = tpu.memref_slice %arg9[%c15_i32_151] : memref<32x!tpu.dma_semaphore, #tpu.memory_space<semaphore_mem>> -> memref<1x!tpu.dma_semaphore, #tpu.memory_space<semaphore_mem>>
    %190 = tpu.memref_squeeze %189 : memref<1x!tpu.dma_semaphore, #tpu.memory_space<semaphore_mem>> -> memref<!tpu.dma_semaphore, #tpu.memory_space<semaphore_mem>>
    tpu.wait_dma2 semaphore(%190 : memref<!tpu.dma_semaphore, #tpu.memory_space<semaphore_mem>>) src(%187 : memref<1x128xf32, #tpu.memory_space<any>>) dst(%188 : memref<1x128xf32, #tpu.memory_space<vmem>>)
    %c16_i32_156 = arith.constant 16 : i32
    %c0_i32_157 = arith.constant 0 : i32
    %c0_i32_158 = arith.constant 0 : i32
    %191 = tpu.memref_slice %arg2[%c0_i32_157, %c0_i32_158] : memref<50x128xf32, #tpu.memory_space<any>> -> memref<1x128xf32, #tpu.memory_space<any>>
    %c16_i32_159 = arith.constant 16 : i32
    %c0_i32_160 = arith.constant 0 : i32
    %192 = tpu.memref_slice %arg8[%c16_i32_159, %c0_i32_160] : memref<32x128xf32, #tpu.memory_space<vmem>> -> memref<1x128xf32, #tpu.memory_space<vmem>>
    %193 = tpu.memref_slice %arg9[%c16_i32_156] : memref<32x!tpu.dma_semaphore, #tpu.memory_space<semaphore_mem>> -> memref<1x!tpu.dma_semaphore, #tpu.memory_space<semaphore_mem>>
    %194 = tpu.memref_squeeze %193 : memref<1x!tpu.dma_semaphore, #tpu.memory_space<semaphore_mem>> -> memref<!tpu.dma_semaphore, #tpu.memory_space<semaphore_mem>>
    tpu.wait_dma2 semaphore(%194 : memref<!tpu.dma_semaphore, #tpu.memory_space<semaphore_mem>>) src(%191 : memref<1x128xf32, #tpu.memory_space<any>>) dst(%192 : memref<1x128xf32, #tpu.memory_space<vmem>>)
    %c17_i32_161 = arith.constant 17 : i32
    %c0_i32_162 = arith.constant 0 : i32
    %c0_i32_163 = arith.constant 0 : i32
    %195 = tpu.memref_slice %arg2[%c0_i32_162, %c0_i32_163] : memref<50x128xf32, #tpu.memory_space<any>> -> memref<1x128xf32, #tpu.memory_space<any>>
    %c17_i32_164 = arith.constant 17 : i32
    %c0_i32_165 = arith.constant 0 : i32
    %196 = tpu.memref_slice %arg8[%c17_i32_164, %c0_i32_165] : memref<32x128xf32, #tpu.memory_space<vmem>> -> memref<1x128xf32, #tpu.memory_space<vmem>>
    %197 = tpu.memref_slice %arg9[%c17_i32_161] : memref<32x!tpu.dma_semaphore, #tpu.memory_space<semaphore_mem>> -> memref<1x!tpu.dma_semaphore, #tpu.memory_space<semaphore_mem>>
    %198 = tpu.memref_squeeze %197 : memref<1x!tpu.dma_semaphore, #tpu.memory_space<semaphore_mem>> -> memref<!tpu.dma_semaphore, #tpu.memory_space<semaphore_mem>>
    tpu.wait_dma2 semaphore(%198 : memref<!tpu.dma_semaphore, #tpu.memory_space<semaphore_mem>>) src(%195 : memref<1x128xf32, #tpu.memory_space<any>>) dst(%196 : memref<1x128xf32, #tpu.memory_space<vmem>>)
    %c18_i32_166 = arith.constant 18 : i32
    %c0_i32_167 = arith.constant 0 : i32
    %c0_i32_168 = arith.constant 0 : i32
    %199 = tpu.memref_slice %arg2[%c0_i32_167, %c0_i32_168] : memref<50x128xf32, #tpu.memory_space<any>> -> memref<1x128xf32, #tpu.memory_space<any>>
    %c18_i32_169 = arith.constant 18 : i32
    %c0_i32_170 = arith.constant 0 : i32
    %200 = tpu.memref_slice %arg8[%c18_i32_169, %c0_i32_170] : memref<32x128xf32, #tpu.memory_space<vmem>> -> memref<1x128xf32, #tpu.memory_space<vmem>>
    %201 = tpu.memref_slice %arg9[%c18_i32_166] : memref<32x!tpu.dma_semaphore, #tpu.memory_space<semaphore_mem>> -> memref<1x!tpu.dma_semaphore, #tpu.memory_space<semaphore_mem>>
    %202 = tpu.memref_squeeze %201 : memref<1x!tpu.dma_semaphore, #tpu.memory_space<semaphore_mem>> -> memref<!tpu.dma_semaphore, #tpu.memory_space<semaphore_mem>>
    tpu.wait_dma2 semaphore(%202 : memref<!tpu.dma_semaphore, #tpu.memory_space<semaphore_mem>>) src(%199 : memref<1x128xf32, #tpu.memory_space<any>>) dst(%200 : memref<1x128xf32, #tpu.memory_space<vmem>>)
    %c19_i32_171 = arith.constant 19 : i32
    %c0_i32_172 = arith.constant 0 : i32
    %c0_i32_173 = arith.constant 0 : i32
    %203 = tpu.memref_slice %arg2[%c0_i32_172, %c0_i32_173] : memref<50x128xf32, #tpu.memory_space<any>> -> memref<1x128xf32, #tpu.memory_space<any>>
    %c19_i32_174 = arith.constant 19 : i32
    %c0_i32_175 = arith.constant 0 : i32
    %204 = tpu.memref_slice %arg8[%c19_i32_174, %c0_i32_175] : memref<32x128xf32, #tpu.memory_space<vmem>> -> memref<1x128xf32, #tpu.memory_space<vmem>>
    %205 = tpu.memref_slice %arg9[%c19_i32_171] : memref<32x!tpu.dma_semaphore, #tpu.memory_space<semaphore_mem>> -> memref<1x!tpu.dma_semaphore, #tpu.memory_space<semaphore_mem>>
    %206 = tpu.memref_squeeze %205 : memref<1x!tpu.dma_semaphore, #tpu.memory_space<semaphore_mem>> -> memref<!tpu.dma_semaphore, #tpu.memory_space<semaphore_mem>>
    tpu.wait_dma2 semaphore(%206 : memref<!tpu.dma_semaphore, #tpu.memory_space<semaphore_mem>>) src(%203 : memref<1x128xf32, #tpu.memory_space<any>>) dst(%204 : memref<1x128xf32, #tpu.memory_space<vmem>>)
    %c20_i32_176 = arith.constant 20 : i32
    %c0_i32_177 = arith.constant 0 : i32
    %c0_i32_178 = arith.constant 0 : i32
    %207 = tpu.memref_slice %arg2[%c0_i32_177, %c0_i32_178] : memref<50x128xf32, #tpu.memory_space<any>> -> memref<1x128xf32, #tpu.memory_space<any>>
    %c20_i32_179 = arith.constant 20 : i32
    %c0_i32_180 = arith.constant 0 : i32
    %208 = tpu.memref_slice %arg8[%c20_i32_179, %c0_i32_180] : memref<32x128xf32, #tpu.memory_space<vmem>> -> memref<1x128xf32, #tpu.memory_space<vmem>>
    %209 = tpu.memref_slice %arg9[%c20_i32_176] : memref<32x!tpu.dma_semaphore, #tpu.memory_space<semaphore_mem>> -> memref<1x!tpu.dma_semaphore, #tpu.memory_space<semaphore_mem>>
    %210 = tpu.memref_squeeze %209 : memref<1x!tpu.dma_semaphore, #tpu.memory_space<semaphore_mem>> -> memref<!tpu.dma_semaphore, #tpu.memory_space<semaphore_mem>>
    tpu.wait_dma2 semaphore(%210 : memref<!tpu.dma_semaphore, #tpu.memory_space<semaphore_mem>>) src(%207 : memref<1x128xf32, #tpu.memory_space<any>>) dst(%208 : memref<1x128xf32, #tpu.memory_space<vmem>>)
    %c21_i32_181 = arith.constant 21 : i32
    %c0_i32_182 = arith.constant 0 : i32
    %c0_i32_183 = arith.constant 0 : i32
    %211 = tpu.memref_slice %arg2[%c0_i32_182, %c0_i32_183] : memref<50x128xf32, #tpu.memory_space<any>> -> memref<1x128xf32, #tpu.memory_space<any>>
    %c21_i32_184 = arith.constant 21 : i32
    %c0_i32_185 = arith.constant 0 : i32
    %212 = tpu.memref_slice %arg8[%c21_i32_184, %c0_i32_185] : memref<32x128xf32, #tpu.memory_space<vmem>> -> memref<1x128xf32, #tpu.memory_space<vmem>>
    %213 = tpu.memref_slice %arg9[%c21_i32_181] : memref<32x!tpu.dma_semaphore, #tpu.memory_space<semaphore_mem>> -> memref<1x!tpu.dma_semaphore, #tpu.memory_space<semaphore_mem>>
    %214 = tpu.memref_squeeze %213 : memref<1x!tpu.dma_semaphore, #tpu.memory_space<semaphore_mem>> -> memref<!tpu.dma_semaphore, #tpu.memory_space<semaphore_mem>>
    tpu.wait_dma2 semaphore(%214 : memref<!tpu.dma_semaphore, #tpu.memory_space<semaphore_mem>>) src(%211 : memref<1x128xf32, #tpu.memory_space<any>>) dst(%212 : memref<1x128xf32, #tpu.memory_space<vmem>>)
    %c22_i32_186 = arith.constant 22 : i32
    %c0_i32_187 = arith.constant 0 : i32
    %c0_i32_188 = arith.constant 0 : i32
    %215 = tpu.memref_slice %arg2[%c0_i32_187, %c0_i32_188] : memref<50x128xf32, #tpu.memory_space<any>> -> memref<1x128xf32, #tpu.memory_space<any>>
    %c22_i32_189 = arith.constant 22 : i32
    %c0_i32_190 = arith.constant 0 : i32
    %216 = tpu.memref_slice %arg8[%c22_i32_189, %c0_i32_190] : memref<32x128xf32, #tpu.memory_space<vmem>> -> memref<1x128xf32, #tpu.memory_space<vmem>>
    %217 = tpu.memref_slice %arg9[%c22_i32_186] : memref<32x!tpu.dma_semaphore, #tpu.memory_space<semaphore_mem>> -> memref<1x!tpu.dma_semaphore, #tpu.memory_space<semaphore_mem>>
    %218 = tpu.memref_squeeze %217 : memref<1x!tpu.dma_semaphore, #tpu.memory_space<semaphore_mem>> -> memref<!tpu.dma_semaphore, #tpu.memory_space<semaphore_mem>>
    tpu.wait_dma2 semaphore(%218 : memref<!tpu.dma_semaphore, #tpu.memory_space<semaphore_mem>>) src(%215 : memref<1x128xf32, #tpu.memory_space<any>>) dst(%216 : memref<1x128xf32, #tpu.memory_space<vmem>>)
    %c23_i32_191 = arith.constant 23 : i32
    %c0_i32_192 = arith.constant 0 : i32
    %c0_i32_193 = arith.constant 0 : i32
    %219 = tpu.memref_slice %arg2[%c0_i32_192, %c0_i32_193] : memref<50x128xf32, #tpu.memory_space<any>> -> memref<1x128xf32, #tpu.memory_space<any>>
    %c23_i32_194 = arith.constant 23 : i32
    %c0_i32_195 = arith.constant 0 : i32
    %220 = tpu.memref_slice %arg8[%c23_i32_194, %c0_i32_195] : memref<32x128xf32, #tpu.memory_space<vmem>> -> memref<1x128xf32, #tpu.memory_space<vmem>>
    %221 = tpu.memref_slice %arg9[%c23_i32_191] : memref<32x!tpu.dma_semaphore, #tpu.memory_space<semaphore_mem>> -> memref<1x!tpu.dma_semaphore, #tpu.memory_space<semaphore_mem>>
    %222 = tpu.memref_squeeze %221 : memref<1x!tpu.dma_semaphore, #tpu.memory_space<semaphore_mem>> -> memref<!tpu.dma_semaphore, #tpu.memory_space<semaphore_mem>>
    tpu.wait_dma2 semaphore(%222 : memref<!tpu.dma_semaphore, #tpu.memory_space<semaphore_mem>>) src(%219 : memref<1x128xf32, #tpu.memory_space<any>>) dst(%220 : memref<1x128xf32, #tpu.memory_space<vmem>>)
    %c24_i32_196 = arith.constant 24 : i32
    %c0_i32_197 = arith.constant 0 : i32
    %c0_i32_198 = arith.constant 0 : i32
    %223 = tpu.memref_slice %arg2[%c0_i32_197, %c0_i32_198] : memref<50x128xf32, #tpu.memory_space<any>> -> memref<1x128xf32, #tpu.memory_space<any>>
    %c24_i32_199 = arith.constant 24 : i32
    %c0_i32_200 = arith.constant 0 : i32
    %224 = tpu.memref_slice %arg8[%c24_i32_199, %c0_i32_200] : memref<32x128xf32, #tpu.memory_space<vmem>> -> memref<1x128xf32, #tpu.memory_space<vmem>>
    %225 = tpu.memref_slice %arg9[%c24_i32_196] : memref<32x!tpu.dma_semaphore, #tpu.memory_space<semaphore_mem>> -> memref<1x!tpu.dma_semaphore, #tpu.memory_space<semaphore_mem>>
    %226 = tpu.memref_squeeze %225 : memref<1x!tpu.dma_semaphore, #tpu.memory_space<semaphore_mem>> -> memref<!tpu.dma_semaphore, #tpu.memory_space<semaphore_mem>>
    tpu.wait_dma2 semaphore(%226 : memref<!tpu.dma_semaphore, #tpu.memory_space<semaphore_mem>>) src(%223 : memref<1x128xf32, #tpu.memory_space<any>>) dst(%224 : memref<1x128xf32, #tpu.memory_space<vmem>>)
    %c0_201 = arith.constant 0 : index
    %c0_202 = arith.constant 0 : index
    %227 = vector.load %arg8[%c0_201, %c0_202] : memref<32x128xf32, #tpu.memory_space<vmem>>, vector<32x128xf32>
    %c0_203 = arith.constant 0 : index
    %c0_204 = arith.constant 0 : index
    %228 = vector.load %arg3[%c0_203, %c0_204] : memref<128x384xf32, #tpu.memory_space<vmem>>, vector<128x384xf32>
    %cst_205 = arith.constant dense<0.000000e+00> : vector<32x384xf32>
    %229 = tpu.matmul %227, %228, %cst_205 {dimension_numbers = #tpu.dot_dimension_numbers<[1], [0], [0], [1], [0, 0, 1, 1], [], []>} : vector<32x128xf32>, vector<128x384xf32>, vector<32x384xf32> -> vector<32x384xf32>
    %c0_206 = arith.constant 0 : index
    %c0_207 = arith.constant 0 : index
    %230 = vector.load %arg4[%c0_206, %c0_207] : memref<1x384xf32, #tpu.memory_space<vmem>>, vector<1x384xf32>
    %231 = vector.broadcast %230 : vector<1x384xf32> to vector<32x384xf32>
    %232 = arith.addf %229, %231 : vector<32x384xf32>
    %233 = vector.extract_strided_slice %232 {offsets = [0, 0], sizes = [32, 128], strides = [1, 1]} : vector<32x384xf32> to vector<32x128xf32>
    %234 = vector.extract_strided_slice %232 {offsets = [0, 128], sizes = [32, 128], strides = [1, 1]} : vector<32x384xf32> to vector<32x128xf32>
    %235 = vector.extract_strided_slice %232 {offsets = [0, 256], sizes = [32, 128], strides = [1, 1]} : vector<32x384xf32> to vector<32x128xf32>
    %cst_208 = arith.constant dense<0.000000e+00> : vector<32x32xf32>
    %236 = tpu.matmul %233, %234, %cst_208 {dimension_numbers = #tpu.dot_dimension_numbers<[1], [1], [0], [0], [0, 0, 1, 0], [], []>} : vector<32x128xf32>, vector<32x128xf32>, vector<32x32xf32> -> vector<32x32xf32>
    %237 = tpu.iota {dimensions = array<i32: 1>} : vector<32x32xi32>
    %c25_i32 = arith.constant 25 : i32
    %238 = vector.broadcast %c25_i32 : i32 to vector<32x32xi32>
    %239 = arith.cmpi slt, %237, %238 : vector<32x32xi32>
    %cst_209 = arith.constant -1.000000e+30 : f32
    %240 = vector.broadcast %cst_209 : f32 to vector<32x32xf32>
    %241 = arith.select %239, %236, %240 : vector<32x32xi1>, vector<32x32xf32>
    %cst_210 = arith.constant dense<0xFF800000> : vector<32xf32>
    %242 = vector.multi_reduction <maximumf>, %241, %cst_210 [1] : vector<32x32xf32> to vector<32xf32>
    %243 = vector.shape_cast %242 : vector<32xf32> to vector<32x1xf32>
    %244 = vector.broadcast %243 : vector<32x1xf32> to vector<32x32xf32>
    %245 = arith.subf %241, %244 : vector<32x32xf32>
    %246 = math.exp %245 : vector<32x32xf32>
    %cst_211 = arith.constant dense<0.000000e+00> : vector<32x128xf32>
    %247 = tpu.matmul %246, %235, %cst_211 {dimension_numbers = #tpu.dot_dimension_numbers<[1], [0], [0], [1], [0, 0, 1, 1], [], []>} : vector<32x32xf32>, vector<32x128xf32>, vector<32x128xf32> -> vector<32x128xf32>
    %c0_212 = arith.constant 0 : index
    %c0_213 = arith.constant 0 : index
    %248 = vector.load %arg5[%c0_212, %c0_213] : memref<1x128xf32, #tpu.memory_space<vmem>>, vector<1x128xf32>
    %cst_214 = arith.constant dense<0.000000e+00> : vector<1x32xf32>
    %249 = tpu.matmul %248, %247, %cst_214 {dimension_numbers = #tpu.dot_dimension_numbers<[1], [1], [0], [0], [0, 0, 1, 0], [], []>} : vector<1x128xf32>, vector<32x128xf32>, vector<1x32xf32> -> vector<1x32xf32>
    %cst_215 = arith.constant 1.000000e+00 : f32
    %250 = vector.broadcast %cst_215 : f32 to vector<1x32xf32>
    %cst_216 = arith.constant dense<0.000000e+00> : vector<1x32xf32>
    %251 = tpu.matmul %250, %246, %cst_216 {dimension_numbers = #tpu.dot_dimension_numbers<[1], [1], [0], [0], [0, 0, 1, 0], [], []>} : vector<1x32xf32>, vector<32x32xf32>, vector<1x32xf32> -> vector<1x32xf32>
    %252 = arith.divf %249, %251 : vector<1x32xf32>
    %c0_217 = arith.constant 0 : index
    %c0_218 = arith.constant 0 : index
    %253 = vector.load %arg6[%c0_217, %c0_218] : memref<1x1xf32, #tpu.memory_space<vmem>>, vector<1x1xf32>
    %254 = vector.broadcast %253 : vector<1x1xf32> to vector<1x32xf32>
    %255 = arith.addf %252, %254 : vector<1x32xf32>
    %256 = arith.negf %255 : vector<1x32xf32>
    %257 = math.exp %256 : vector<1x32xf32>
    %cst_219 = arith.constant 1.000000e+00 : f32
    %258 = vector.broadcast %cst_219 : f32 to vector<1x32xf32>
    %259 = arith.addf %258, %257 : vector<1x32xf32>
    %260 = arith.divf %258, %259 : vector<1x32xf32>
    %c0_220 = arith.constant 0 : index
    %c0_221 = arith.constant 0 : index
    %261 = vector.load %arg7[%c0_220, %c0_221] : memref<1x32xf32, #tpu.memory_space<vmem>>, vector<1x32xf32>
    tpu.vector_store %arg7[%c0_220, %c0_221], %260 {strides = array<i32>} : memref<1x32xf32, #tpu.memory_space<vmem>>, vector<1x32xf32>,
    return
  }
  func.func @transform_1(%arg0: i32, %arg1: memref<25xi32, #tpu.memory_space<smem>>) -> (i32, i32) {
    %c0_i32 = arith.constant 0 : i32
    %c0_i32_0 = arith.constant 0 : i32
    %c0_i32_1 = arith.constant 0 : i32
    return %c0_i32, %c0_i32_0 : i32, i32
  }
  func.func @transform_2(%arg0: i32, %arg1: memref<25xi32, #tpu.memory_space<smem>>) -> (i32, i32) {
    %c0_i32 = arith.constant 0 : i32
    %c0_i32_0 = arith.constant 0 : i32
    %c0_i32_1 = arith.constant 0 : i32
    return %c0_i32, %c0_i32_0 : i32, i32
  }
  func.func @transform_3(%arg0: i32, %arg1: memref<25xi32, #tpu.memory_space<smem>>) -> (i32, i32) {
    %c0_i32 = arith.constant 0 : i32
    %c0_i32_0 = arith.constant 0 : i32
    %c0_i32_1 = arith.constant 0 : i32
    return %c0_i32, %c0_i32_0 : i32, i32
  }
  func.func @transform_4(%arg0: i32, %arg1: memref<25xi32, #tpu.memory_space<smem>>) -> (i32, i32) {
    %c0_i32 = arith.constant 0 : i32
    %c0_i32_0 = arith.constant 0 : i32
    %c0_i32_1 = arith.constant 0 : i32
    return %c0_i32, %c0_i32_0 : i32, i32
  }
  func.func @transform_5(%arg0: i32, %arg1: memref<25xi32, #tpu.memory_space<smem>>) -> (i32, i32) {
    %c0_i32 = arith.constant 0 : i32
    %c0_i32_0 = arith.constant 0 : i32
    %c0_i32_1 = arith.constant 0 : i32
    return %c0_i32, %c0_i32_0 : i32, i32
  }
}

</mosaic_0001>

<bundles_post_ra>
// kernel: attention_sentiment_forward.1
= control target key start
LH: loop header
LB: loop body
LE: loop exit
PB: predicated region body
PF: predicated region fallthrough
CT: control target
= control target key end

     0   :  { %s2965_s0 = inlined_call_operand.vmem [shape: s32[25], index: 0, kind: input, shape index: {}]   ;;  %s2966_s1 = inlined_call_operand.hbm [shape: f32[50,128], index: 1, kind: input, shape index: {}]   ;;  %s2967_s2 = inlined_call_operand.hbm [shape: f32[128,384], index: 2, kind: input, shape index: {}]   ;;  %s2968_s3 = inlined_call_operand.vmem [shape: f32[1,384], index: 3, kind: input, shape index: {}]   ;;  %s2969_s4 = inlined_call_operand.vmem [shape: f32[1,128], index: 4, kind: input, shape index: {}]   ;;  %s2970_s6 = inlined_call_operand.vmem [shape: f32[1,32], index: 6, kind: output, shape index: {}]   ;;  %s2971_s5 = inlined_call_operand.<no memory space> [shape: f32[1,1], index: 5, kind: input, shape index: {}]  }
   0x1   :  { %s11_s23 = sshll.u32 %s2965_s0, 4  ;;  %v15_v0 = vstv %s2971_s5  ;;  %s12_s23 = int_to_ptr.vmem [resolvable:$true] %s11_s23 }
   0x2   :  { %16 = vst [vmem:[#allocation6] sm:$0x1] %v15_v0  ;;  %s1759_s26 = scalar_lea.vmem %s12_s23, 16  ;;  %p1764_p1 = scmp.lt.s32.totalorder %s12_s23, %s12_s23 }
   0x3   :  { %p1760_p0 = scmp.ne.s32.totalorder %s12_s23, %s1759_s26  ;;  %p1765_p2 = scmp.lt.s32.totalorder %s1759_s26, %s1759_s26 }
   0x5   :  { %p1766_p3 = por %p1765_p2, %p1764_p1 }
   0x7   :  { %p1767_p4 = pnand %p1766_p3, %p1760_p0 }
   0x9   :  { %1770 = shalt.err (!%p1767_p4)  }
   0xa   :  { %s2447_s27 = smov [#allocation5]  }
   0xb   :  { %14 = dma.vmem_to_smem %s12_s23, 16, %s2447_s27, [#allocation4] }
   0xc   :  { %2393 = dma.done.wait [#allocation4], 16 }
   0xd   :  { %2394 = vsyncadd [#allocation4], 4294967280 }
   0xe   :  { %18 = sfence }
   0xf   :  { %19 = vsyncpa [#allocation8], 0  ;;  %s2448_s0 = smov [#allocation7]   ;;  %s1771_s30 = scalar_lea.hbm %s2967_s2, 6144 }
  0x10   :  { %s25_s28 = sshll.u32 %s2448_s0, 4  ;;  %p1772_p5 = scmp.ne.s32.totalorder %s2967_s2, %s1771_s30  ;;  %s26_s28 = int_to_ptr.vmem [resolvable:$true] %s25_s28 }
  0x11   :  { %p1775_p6 = scmp.lt.u32.totalorder %s1771_s30, %s2967_s2 }
  0x13   :  { %p1777_p7 = pnand %p1775_p6, %p1772_p5 }
  0x15   :  { %1780 = shalt.err (!%p1777_p7)
}
  0x16   :  { %s1781_s11 = scalar_lea.vmem %s26_s28, 6144  ;;  %p1786_p9 = scmp.lt.s32.totalorder %s26_s28, %s26_s28 }
  0x17   :  { %p1782_p8 = scmp.ne.s32.totalorder %s26_s28, %s1781_s11  ;;  %p1787_p10 = scmp.lt.s32.totalorder %s1781_s11, %s1781_s11 }
  0x19   :  { %p1788_p11 = por %p1787_p10, %p1786_p9 }
  0x1b   :  { %p1789_p12 = pnand %p1788_p11, %p1782_p8 }
  0x1d   :  { %1792 = shalt.err (!%p1789_p12)
}
  0x1e   :  { %s2449_s12 = smov 384   ;;  %s2450_s13 = smov 24  }
  0x1f   :  { %31 = dma.hbm_to_vmem [thread:$0]  %s2967_s2, 6144, %s26_s28, [#allocation8], %s2449_s12, %s2449_s12, %s2450_s13  }
  0x20   :  { %2395 = dma.done.wait [#allocation8], 6144  }
  0x21   :  { %2396 = vsyncadd [#allocation8], 4294961152  ;;  %v2451_v1 = vmov 0.0   ;;  %s42_s16 = sld [smem:[#allocation5]]  ;;  %s2452_s17 = smov [#allocation2]  }
  0x22   :  { %41 = vst [vmem:[#allocation2 + $0x19] sm:$0x7f] %v2451_v1  ;;  %s52_s18 = sshll.u32 %s2452_s17, 4  ;;  %s2537_s19 = sld [smem:[#allocation5 + $0x1]]  ;;  %s2535_s18 = int_to_ptr.vmem [resolvable:$true] %s52_s18 }
  0x23   :  { %s2453_s20 = smov [#allocation2 + $0x1]   ;;  %s2539_s22 = sld [smem:[#allocation5 + $0x2]] }
  0x24   :  { %s68_s21 = sshll.u32 %s2453_s20, 4  ;;  %s2454_s2 = smov [#allocation2 + $0x2]   ;;  %s2541_s21 = int_to_ptr.vmem [resolvable:$true] %s68_s21 }
  0x25   :  { %s84_s23 = sshll.u32 %s2454_s2, 4  ;;  %s2543_s24 = sld [smem:[#allocation5 + $0x3]]  ;;  %s2545_s23 = int_to_ptr.vmem [resolvable:$true] %s84_s23 }
  0x26   :  { %s2455_s26 = smov [#allocation2 + $0x3]   ;;  %s2556_s9 = scalar_lea.hbm %s2966_s1, 896 }
  0x27   :  { %s1391_s25 = sshll.u32 %s42_s16, 4  ;;  %s2547_s27 = sshll.u32 %s2455_s26, 4  ;;  %s101_s27 = int_to_ptr.vmem [resolvable:$true] %s2547_s27 }
  0x28   :  { %s44_s29 = scalar_lea.hbm %s2966_s1, %s1391_s25  ;;  %s1393_s5 = sshll.u32 %s2537_s19, 4 }
  0x29   :  { %s1793_s30 = scalar_lea.hbm %s44_s29, 16  ;;  %p1796_p0 = scmp.lt.u32.totalorder %s44_s29, %s2966_s1 }
  0x2a   :  { %p1794_p13 = scmp.ne.s32.totalorder %s44_s29, %s1793_s30  ;;  %p1797_p1 = scmp.lt.u32.totalorder %s2556_s9, %s1793_s30 }
  0x2b   :  { %p1799_p3 = scmp.lt.u32.totalorder %s1793_s30, %s44_s29 }
  0x2c   :  { %p1798_p2 = por %p1797_p1, %p1796_p0 }
  0x2e   :  { %p1800_p4 = por %p1799_p3, %p1798_p2 }
  0x30   :  { %p1801_p5 = pnand %p1800_p4, %p1794_p13 }
  0x32   :  { %1804 = shalt.err (!%p1801_p5)  }
  0x33   :  { %s1805_s12 = scalar_lea.vmem %s2535_s18, 16  ;;  %s2565_s13 = scalar_lea.vmem %s2535_s18, 512 }
  0x34   :  { %p1806_p6 = scmp.ne.s32.totalorder %s2535_s18, %s1805_s12  ;;  %p1810_p7 = scmp.lt.s32.totalorder %s2535_s18, %s2535_s18 }
  0x35   :  { %p1811_p8 = scmp.lt.s32.totalorder %s2565_s13, %s1805_s12 }
  0x37   :  { %p1812_p9 = por %p1811_p8, %p1810_p7 }
  0x39   :  { %p1813_p10 = pnand %p1812_p9, %p1806_p6 }
  0x3b   :  { %1816 = shalt.err (!%p1813_p10)  }
  0x3c   :  { %55 = dma.hbm_to_vmem [thread:$0]  %s44_s29, 16, %s2535_s18, [#allocation3] }
  0x3d   :  { %s58_s16 = scalar_lea.hbm %s2966_s1, %s1393_s5  ;;  %s1395_s17 = sshll.u32 %s2539_s22, 4 }
  0x3e   :  { %s1817_s19 = scalar_lea.hbm %s58_s16, 16  ;;  %p1820_p12 = scmp.lt.u32.totalorder %s58_s16, %s2966_s1 }
  0x3f   :  { %p1818_p11 = scmp.ne.s32.totalorder %s58_s16, %s1817_s19  ;;  %p1821_p13 = scmp.lt.u32.totalorder %s2556_s9, %s1817_s19 }
  0x40   :  { %p1823_p1 = scmp.lt.u32.totalorder %s1817_s19, %s58_s16 }
  0x41   :  { %p1822_p0 = por %p1821_p13, %p1820_p12 }
  0x43   :  { %p1824_p2 = por %p1823_p1, %p1822_p0 }
  0x45   :  { %p1825_p3 = pnand %p1824_p2, %p1818_p11 }
  0x47   :  { %1828 = shalt.err (!%p1825_p3)  }
  0x48   :  { %s1829_s25 = scalar_lea.vmem %s2541_s21, 16  ;;  %p1834_p5 = scmp.lt.s32.totalorder %s2541_s21, %s2535_s18 }
  0x49   :  { %p1830_p4 = scmp.ne.s32.totalorder %s2541_s21, %s1829_s25  ;;  %p1835_p6 = scmp.lt.s32.totalorder %s2565_s13, %s1829_s25 }
  0x4b   :  { %p1836_p7 = por %p1835_p6, %p1834_p5 }
  0x4d   :  { %p1837_p8 = pnand %p1836_p7, %p1830_p4 }
  0x4f   :  { %1840 = shalt.err (!%p1837_p8)  }
  0x50   :  { %71 = dma.hbm_to_vmem [thread:$0]  %s58_s16, 16, %s2541_s21, [#allocation3 + $0x1] }
  0x51   :  { %s74_s0 = scalar_lea.hbm %s2966_s1, %s1395_s17  ;;  %s1397_s28 = sshll.u32 %s2543_s24, 4 }
  0x52   :  { %s1841_s29 = scalar_lea.hbm %s74_s0, 16  ;;  %p1844_p10 = scmp.lt.u32.totalorder %s74_s0, %s2966_s1 }
  0x53   :  { %p1842_p9 = scmp.ne.s32.totalorder %s74_s0, %s1841_s29  ;;  %p1845_p11 = scmp.lt.u32.totalorder %s2556_s9, %s1841_s29 }
  0x54   :  { %p1847_p13 = scmp.lt.u32.totalorder %s1841_s29, %s74_s0 }
  0x55   :  { %p1846_p12 = por %p1845_p11, %p1844_p10 }
  0x57   :  { %p1848_p0 = por %p1847_p13, %p1846_p12 }
  0x59   :  { %p1849_p1 = pnand %p1848_p0, %p1842_p9 }
  0x5b   :  { %1852 = shalt.err (!%p1849_p1)  }
  0x5c   :  { %s1853_s21 = scalar_lea.vmem %s2545_s23, 16  ;;  %p1858_p3 = scmp.lt.s32.totalorder %s2545_s23, %s2535_s18 }
  0x5d   :  { %p1854_p2 = scmp.ne.s32.totalorder %s2545_s23, %s1853_s21  ;;  %p1859_p4 = scmp.lt.s32.totalorder %s2565_s13, %s1853_s21 }
  0x5f   :  { %p1860_p5 = por %p1859_p4, %p1858_p3 }
  0x61   :  { %p1861_p6 = pnand %p1860_p5, %p1854_p2 }
  0x63   :  { %1864 = shalt.err (!%p1861_p6)  }
  0x64   :  { %87 = dma.hbm_to_vmem [thread:$0]  %s74_s0, 16, %s2545_s23, [#allocation3 + $0x2] }
  0x65   :  { %s90_s8 = scalar_lea.hbm %s2966_s1, %s1397_s28 }
  0x66   :  { %s1865_s10 = scalar_lea.hbm %s90_s8, 16  ;;  %p1868_p8 = scmp.lt.u32.totalorder %s90_s8, %s2966_s1 }
  0x67   :  { %p1866_p7 = scmp.ne.s32.totalorder %s90_s8, %s1865_s10  ;;  %p1869_p9 = scmp.lt.u32.totalorder %s2556_s9, %s1865_s10 }
  0x68   :  { %p1871_p11 = scmp.lt.u32.totalorder %s1865_s10, %s90_s8 }
  0x69   :  { %p1870_p10 = por %p1869_p9, %p1868_p8 }
  0x6b   :  { %p1872_p12 = por %p1871_p11, %p1870_p10 }
  0x6d   :  { %p1873_p13 = pnand %p1872_p12, %p1866_p7 }
  0x6f   :  { %1876 = shalt.err (!%p1873_p13)  }
  0x70   :  { %s1877_s14 = scalar_lea.vmem %s101_s27, 16  ;;  %p1882_p1 = scmp.lt.s32.totalorder %s101_s27, %s2535_s18 }
  0x71   :  { %p1878_p0 = scmp.ne.s32.totalorder %s101_s27, %s1877_s14  ;;  %p1883_p2 = scmp.lt.s32.totalorder %s2565_s13, %s1877_s14 }
  0x73   :  { %p1884_p3 = por %p1883_p2, %p1882_p1 }
  0x75   :  { %p1885_p4 = pnand %p1884_p3, %p1878_p0 }
  0x77   :  { %1888 = shalt.err (!%p1885_p4)  }
  0x78   :  { %103 = dma.hbm_to_vmem [thread:$0]  %s90_s8, 16, %s101_s27, [#allocation3 + $0x3] }
  0x79   :  { %s1398_s23 = sld [smem:[#allocation5 + $0x4]]  ;;  %s2456_s15 = smov [#allocation2 + $0x4]  }
  0x7a   :  { %s116_s16 = sshll.u32 %s2456_s15, 4  ;;  %s2609_s17 = sld [smem:[#allocation5 + $0x5]]  ;;  %s117_s16 = int_to_ptr.vmem [resolvable:$true] %s116_s16 }
  0x7b   :  { %s2457_s19 = smov [#allocation2 + $0x5]   ;;  %s2611_s2 = sld [smem:[#allocation5 + $0x6]] }
  0x7c   :  { %s132_s20 = sshll.u32 %s2457_s19, 4  ;;  %s2458_s25 = smov [#allocation2 + $0x6]   ;;  %s2613_s20 = int_to_ptr.vmem [resolvable:$true] %s132_s20 }
  0x7d   :  { %s148_s22 = sshll.u32 %s2458_s25, 4  ;;  %s2615_s26 = sld [smem:[#allocation5 + $0x7]]  ;;  %s2617_s22 = int_to_ptr.vmem [resolvable:$true] %s148_s22 }
  0x7f   :  { %s1399_s0 = sshll.u32 %s1398_s23, 4 }
  0x80   :  { %s106_s29 = scalar_lea.hbm %s2966_s1, %s1399_s0  ;;  %s1401_s5 = sshll.u32 %s2609_s17, 4 }
  0x81   :  { %s1889_s30 = scalar_lea.hbm %s106_s29, 16  ;;  %p1892_p6 = scmp.lt.u32.totalorder %s106_s29, %s2966_s1 }
  0x82   :  { %p1890_p5 = scmp.ne.s32.totalorder %s106_s29, %s1889_s30  ;;  %p1893_p7 = scmp.lt.u32.totalorder %s2556_s9, %s1889_s30 }
  0x83   :  { %p1895_p9 = scmp.lt.u32.totalorder %s1889_s30, %s106_s29 }
  0x84   :  { %p1894_p8 = por %p1893_p7, %p1892_p6 }
  0x86   :  { %p1896_p10 = por %p1895_p9, %p1894_p8 }
  0x88   :  { %p1897_p11 = pnand %p1896_p10, %p1890_p5 }
  0x8a   :  { %1900 = shalt.err (!%p1897_p11)  }
  0x8b   :  { %s1901_s7 = scalar_lea.vmem %s117_s16, 16  ;;  %p1906_p13 = scmp.lt.s32.totalorder %s117_s16, %s2535_s18 }
  0x8c   :  { %p1902_p12 = scmp.ne.s32.totalorder %s117_s16, %s1901_s7  ;;  %p1907_p0 = scmp.lt.s32.totalorder %s2565_s13, %s1901_s7 }
  0x8e   :  { %p1908_p1 = por %p1907_p0, %p1906_p13 }
  0x90   :  { %p1909_p2 = pnand %p1908_p1, %p1902_p12 }
  0x92   :  { %1912 = shalt.err (!%p1909_p2)  }
  0x93   :  { %119 = dma.hbm_to_vmem [thread:$0]  %s106_s29, 16, %s117_s16, [#allocation3 + $0x4] }
  0x94   :  { %s122_s11 = scalar_lea.hbm %s2966_s1, %s1401_s5  ;;  %s1403_s12 = sshll.u32 %s2611_s2, 4 }
  0x95   :  { %s1913_s14 = scalar_lea.hbm %s122_s11, 16  ;;  %p1916_p4 = scmp.lt.u32.totalorder %s122_s11, %s2966_s1 }
  0x96   :  { %p1914_p3 = scmp.ne.s32.totalorder %s122_s11, %s1913_s14  ;;  %p1917_p5 = scmp.lt.u32.totalorder %s2556_s9, %s1913_s14 }
  0x97   :  { %p1919_p7 = scmp.lt.u32.totalorder %s1913_s14, %s122_s11 }
  0x98   :  { %p1918_p6 = por %p1917_p5, %p1916_p4 }
  0x9a   :  { %p1920_p8 = por %p1919_p7, %p1918_p6 }
  0x9c   :  { %p1921_p9 = pnand %p1920_p8, %p1914_p3 }
  0x9e   :  { %1924 = shalt.err (!%p1921_p9)  }
  0x9f   :  { %s1925_s16 = scalar_lea.vmem %s2613_s20, 16  ;;  %p1930_p11 = scmp.lt.s32.totalorder %s2613_s20, %s2535_s18 }
  0xa0   :  { %p1926_p10 = scmp.ne.s32.totalorder %s2613_s20, %s1925_s16  ;;  %p1931_p12 = scmp.lt.s32.totalorder %s2565_s13, %s1925_s16 }
  0xa2   :  { %p1932_p13 = por %p1931_p12, %p1930_p11 }
  0xa4   :  { %p1933_p0 = pnand %p1932_p13, %p1926_p10 }
  0xa6   :  { %1936 = shalt.err (!%p1933_p0)  }
  0xa7   :  { %135 = dma.hbm_to_vmem [thread:$0]  %s122_s11, 16, %s2613_s20, [#allocation3 + $0x5] }
  0xa8   :  { %s138_s2 = scalar_lea.hbm %s2966_s1, %s1403_s12  ;;  %s1405_s25 = sshll.u32 %s2615_s26, 4 }
  0xa9   :  { %s1937_s0 = scalar_lea.hbm %s138_s2, 16  ;;  %p1940_p2 = scmp.lt.u32.totalorder %s138_s2, %s2966_s1 }
  0xaa   :  { %p1938_p1 = scmp.ne.s32.totalorder %s138_s2, %s1937_s0  ;;  %p1941_p3 = scmp.lt.u32.totalorder %s2556_s9, %s1937_s0 }
  0xab   :  { %p1943_p5 = scmp.lt.u32.totalorder %s1937_s0, %s138_s2 }
  0xac   :  { %p1942_p4 = por %p1941_p3, %p1940_p2 }
  0xae   :  { %p1944_p6 = por %p1943_p5, %p1942_p4 }
  0xb0   :  { %p1945_p7 = pnand %p1944_p6, %p1938_p1 }
  0xb2   :  { %1948 = shalt.err (!%p1945_p7)  }
  0xb3   :  { %s1949_s20 = scalar_lea.vmem %s2617_s22, 16  ;;  %p1954_p9 = scmp.lt.s32.totalorder %s2617_s22, %s2535_s18 }
  0xb4   :  { %p1950_p8 = scmp.ne.s32.totalorder %s2617_s22, %s1949_s20  ;;  %p1955_p10 = scmp.lt.s32.totalorder %s2565_s13, %s1949_s20 }
  0xb6   :  { %p1956_p11 = por %p1955_p10, %p1954_p9 }
  0xb8   :  { %p1957_p12 = pnand %p1956_p11, %p1950_p8 }
  0xba   :  { %1960 = shalt.err (!%p1957_p12)  }
  0xbb   :  { %151 = dma.hbm_to_vmem [thread:$0]  %s138_s2, 16, %s2617_s22, [#allocation3 + $0x6] }
  0xbc   :  { %s154_s5 = scalar_lea.hbm %s2966_s1, %s1405_s25  ;;  %s2459_s30 = smov [#allocation2 + $0x7]  }
  0xbd   :  { %s164_s21 = sshll.u32 %s2459_s30, 4  ;;  %s2660_s24 = sld [smem:[#allocation5 + $0x8]]  ;;  %s165_s21 = int_to_ptr.vmem [resolvable:$true] %s164_s21 }
  0xbe   :  { %s1961_s7 = scalar_lea.hbm %s154_s5, 16  ;;  %p1964_p0 = scmp.lt.u32.totalorder %s154_s5, %s2966_s1 }
  0xbf   :  { %p1962_p13 = scmp.ne.s32.totalorder %s154_s5, %s1961_s7  ;;  %p1965_p1 = scmp.lt.u32.totalorder %s2556_s9, %s1961_s7 }
  0xc0   :  { %p1967_p3 = scmp.lt.u32.totalorder %s1961_s7, %s154_s5 }
  0xc1   :  { %p1966_p2 = por %p1965_p1, %p1964_p0 }
  0xc3   :  { %p1968_p4 = por %p1967_p3, %p1966_p2 }
  0xc5   :  { %p1969_p5 = pnand %p1968_p4, %p1962_p13 }
  0xc7   :  { %1972 = shalt.err (!%p1969_p5)  }
  0xc8   :  { %s1973_s22 = scalar_lea.vmem %s165_s21, 16  ;;  %p1978_p7 = scmp.lt.s32.totalorder %s165_s21, %s2535_s18 }
  0xc9   :  { %p1974_p6 = scmp.ne.s32.totalorder %s165_s21, %s1973_s22  ;;  %p1979_p8 = scmp.lt.s32.totalorder %s2565_s13, %s1973_s22 }
  0xcb   :  { %p1980_p9 = por %p1979_p8, %p1978_p7 }
  0xcd   :  { %p1981_p10 = pnand %p1980_p9, %p1974_p6 }
  0xcf   :  { %1984 = shalt.err (!%p1981_p10)  }
  0xd0   :  { %167 = dma.hbm_to_vmem [thread:$0]  %s154_s5, 16, %s165_s21, [#allocation3 + $0x7] }
  0xd1   :  { %s2460_s11 = smov [#allocation2 + $0x8]   ;;  %s2668_s14 = sld [smem:[#allocation5 + $0x9]] }
  0xd2   :  { %s180_s12 = sshll.u32 %s2460_s11, 4  ;;  %s2461_s23 = smov [#allocation2 + $0x9]   ;;  %s181_s12 = int_to_ptr.vmem [resolvable:$true] %s180_s12 }
  0xd3   :  { %s196_s15 = sshll.u32 %s2461_s23, 4  ;;  %s2670_s16 = sld [smem:[#allocation5 + $0xa]]  ;;  %s2673_s15 = int_to_ptr.vmem [resolvable:$true] %s196_s15 }
  0xd4   :  { %s1407_s17 = sshll.u32 %s2660_s24, 4 }
  0xd5   :  { %s170_s25 = scalar_lea.hbm %s2966_s1, %s1407_s17 }
  0xd6   :  { %s1985_s0 = scalar_lea.hbm %s170_s25, 16  ;;  %p1988_p12 = scmp.lt.u32.totalorder %s170_s25, %s2966_s1 }
  0xd7   :  { %p1986_p11 = scmp.ne.s32.totalorder %s170_s25, %s1985_s0  ;;  %p1989_p13 = scmp.lt.u32.totalorder %s2556_s9, %s1985_s0 }
  0xd8   :  { %p1991_p1 = scmp.lt.u32.totalorder %s1985_s0, %s170_s25 }
  0xd9   :  { %p1990_p0 = por %p1989_p13, %p1988_p12 }
  0xdb   :  { %p1992_p2 = por %p1991_p1, %p1990_p0 }
  0xdd   :  { %p1993_p3 = pnand %p1992_p2, %p1986_p11 }
  0xdf   :  { %1996 = shalt.err (!%p1993_p3)  }
  0xe0   :  { %s1997_s20 = scalar_lea.vmem %s181_s12, 16  ;;  %p2002_p5 = scmp.lt.s32.totalorder %s181_s12, %s2535_s18 }
  0xe1   :  { %p1998_p4 = scmp.ne.s32.totalorder %s181_s12, %s1997_s20  ;;  %p2003_p6 = scmp.lt.s32.totalorder %s2565_s13, %s1997_s20 }
  0xe3   :  { %p2004_p7 = por %p2003_p6, %p2002_p5 }
  0xe5   :  { %p2005_p8 = pnand %p2004_p7, %p1998_p4 }
  0xe7   :  { %2008 = shalt.err (!%p2005_p8)  }
  0xe8   :  { %183 = dma.hbm_to_vmem [thread:$0]  %s170_s25, 16, %s181_s12, [#allocation3 + $0x8] }
  0xe9   :  { %s1409_s26 = sshll.u32 %s2668_s14, 4  ;;  %s2462_s29 = smov [#allocation2 + $0xa]  }
  0xea   :  { %s212_s5 = sshll.u32 %s2462_s29, 4  ;;  %s186_s24 = scalar_lea.hbm %s2966_s1, %s1409_s26  ;;  %s2688_s5 = int_to_ptr.vmem [resolvable:$true] %s212_s5 }
  0xeb   :  { %s2009_s7 = scalar_lea.hbm %s186_s24, 16  ;;  %p2012_p10 = scmp.lt.u32.totalorder %s186_s24, %s2966_s1 }
  0xec   :  { %p2010_p9 = scmp.ne.s32.totalorder %s186_s24, %s2009_s7  ;;  %p2013_p11 = scmp.lt.u32.totalorder %s2556_s9, %s2009_s7 }
  0xed   :  { %p2015_p13 = scmp.lt.u32.totalorder %s2009_s7, %s186_s24 }
  0xee   :  { %p2014_p12 = por %p2013_p11, %p2012_p10 }
  0xf0   :  { %p2016_p0 = por %p2015_p13, %p2014_p12 }
  0xf2   :  { %p2017_p1 = pnand %p2016_p0, %p2010_p9 }
  0xf4   :  { %2020 = shalt.err (!%p2017_p1)  }
  0xf5   :  { %s2021_s22 = scalar_lea.vmem %s2673_s15, 16  ;;  %p2026_p3 = scmp.lt.s32.totalorder %s2673_s15, %s2535_s18 }
  0xf6   :  { %p2022_p2 = scmp.ne.s32.totalorder %s2673_s15, %s2021_s22  ;;  %p2027_p4 = scmp.lt.s32.totalorder %s2565_s13, %s2021_s22 }
  0xf8   :  { %p2028_p5 = por %p2027_p4, %p2026_p3 }
  0xfa   :  { %p2029_p6 = pnand %p2028_p5, %p2022_p2 }
  0xfc   :  { %2032 = shalt.err (!%p2029_p6)  }
  0xfd   :  { %199 = dma.hbm_to_vmem [thread:$0]  %s186_s24, 16, %s2673_s15, [#allocation3 + $0x9] }
  0xfe   :  { %s1411_s11 = sshll.u32 %s2670_s16, 4  ;;  %s2701_s12 = sld [smem:[#allocation5 + $0xb]] }
  0xff   :  { %s202_s17 = scalar_lea.hbm %s2966_s1, %s1411_s11 }
 0x100   :  { %s2033_s19 = scalar_lea.hbm %s202_s17, 16  ;;  %p2036_p8 = scmp.lt.u32.totalorder %s202_s17, %s2966_s1 }
 0x101   :  { %p2034_p7 = scmp.ne.s32.totalorder %s202_s17, %s2033_s19  ;;  %p2037_p9 = scmp.lt.u32.totalorder %s2556_s9, %s2033_s19 }
 0x102   :  { %p2039_p11 = scmp.lt.u32.totalorder %s2033_s19, %s202_s17 }
 0x103   :  { %p2038_p10 = por %p2037_p9, %p2036_p8 }
 0x105   :  { %p2040_p12 = por %p2039_p11, %p2038_p10 }
 0x107   :  { %p2041_p13 = pnand %p2040_p12, %p2034_p7 }
 0x109   :  { %2044 = shalt.err (!%p2041_p13)  }
 0x10a   :  { %s2045_s15 = scalar_lea.vmem %s2688_s5, 16  ;;  %p2050_p1 = scmp.lt.s32.totalorder %s2688_s5, %s2535_s18 }
 0x10b   :  { %p2046_p0 = scmp.ne.s32.totalorder %s2688_s5, %s2045_s15  ;;  %p2051_p2 = scmp.lt.s32.totalorder %s2565_s13, %s2045_s15 }
 0x10d   :  { %p2052_p3 = por %p2051_p2, %p2050_p1 }
 0x10f   :  { %p2053_p4 = pnand %p2052_p3, %p2046_p0 }
 0x111   :  { %2056 = shalt.err (!%p2053_p4)  }
 0x112   :  { %215 = dma.hbm_to_vmem [thread:$0]  %s202_s17, 16, %s2688_s5, [#allocation3 + $0xa] }
 0x113   :  { %s2463_s16 = smov [#allocation2 + $0xb]   ;;  %s2716_s27 = sld [smem:[#allocation5 + $0xc]] }
 0x114   :  { %s228_s0 = sshll.u32 %s2463_s16, 4  ;;  %s2464_s28 = smov [#allocation2 + $0xc]   ;;  %s229_s0 = int_to_ptr.vmem [resolvable:$true] %s228_s0 }
 0x115   :  { %s244_s20 = sshll.u32 %s2464_s28, 4  ;;  %s2718_s26 = sld [smem:[#allocation5 + $0xd]]  ;;  %s2721_s20 = int_to_ptr.vmem [resolvable:$true] %s244_s20 }
 0x116   :  { %s1413_s29 = sshll.u32 %s2701_s12, 4 }
 0x117   :  { %s218_s24 = scalar_lea.hbm %s2966_s1, %s1413_s29 }
 0x118   :  { %s2057_s7 = scalar_lea.hbm %s218_s24, 16  ;;  %p2060_p6 = scmp.lt.u32.totalorder %s218_s24, %s2966_s1 }
 0x119   :  { %p2058_p5 = scmp.ne.s32.totalorder %s218_s24, %s2057_s7  ;;  %p2061_p7 = scmp.lt.u32.totalorder %s2556_s9, %s2057_s7 }
 0x11a   :  { %p2063_p9 = scmp.lt.u32.totalorder %s2057_s7, %s218_s24 }
 0x11b   :  { %p2062_p8 = por %p2061_p7, %p2060_p6 }
 0x11d   :  { %p2064_p10 = por %p2063_p9, %p2062_p8 }
 0x11f   :  { %p2065_p11 = pnand %p2064_p10, %p2058_p5 }
 0x121   :  { %2068 = shalt.err (!%p2065_p11)  }
 0x122   :  { %s2069_s10 = scalar_lea.vmem %s229_s0, 16  ;;  %p2074_p13 = scmp.lt.s32.totalorder %s229_s0, %s2535_s18 }
 0x123   :  { %p2070_p12 = scmp.ne.s32.totalorder %s229_s0, %s2069_s10  ;;  %p2075_p0 = scmp.lt.s32.totalorder %s2565_s13, %s2069_s10 }
 0x125   :  { %p2076_p1 = por %p2075_p0, %p2074_p13 }
 0x127   :  { %p2077_p2 = pnand %p2076_p1, %p2070_p12 }
 0x129   :  { %2080 = shalt.err (!%p2077_p2)  }
 0x12a   :  { %231 = dma.hbm_to_vmem [thread:$0]  %s218_s24, 16, %s229_s0, [#allocation3 + $0xb] }
 0x12b   :  { %s1415_s22 = sshll.u32 %s2716_s27, 4  ;;  %s2465_s11 = smov [#allocation2 + $0xd]  }
 0x12c   :  { %s260_s12 = sshll.u32 %s2465_s11, 4  ;;  %s234_s17 = scalar_lea.hbm %s2966_s1, %s1415_s22  ;;  %s2736_s12 = int_to_ptr.vmem [resolvable:$true] %s260_s12 }
 0x12d   :  { %s2081_s19 = scalar_lea.hbm %s234_s17, 16  ;;  %p2084_p4 = scmp.lt.u32.totalorder %s234_s17, %s2966_s1 }
 0x12e   :  { %p2082_p3 = scmp.ne.s32.totalorder %s234_s17, %s2081_s19  ;;  %p2085_p5 = scmp.lt.u32.totalorder %s2556_s9, %s2081_s19 }
 0x12f   :  { %p2087_p7 = scmp.lt.u32.totalorder %s2081_s19, %s234_s17 }
 0x130   :  { %p2086_p6 = por %p2085_p5, %p2084_p4 }
 0x132   :  { %p2088_p8 = por %p2087_p7, %p2086_p6 }
 0x134   :  { %p2089_p9 = pnand %p2088_p8, %p2082_p3 }
 0x136   :  { %2092 = shalt.err (!%p2089_p9)  }
 0x137   :  { %s2093_s15 = scalar_lea.vmem %s2721_s20, 16  ;;  %p2098_p11 = scmp.lt.s32.totalorder %s2721_s20, %s2535_s18 }
 0x138   :  { %p2094_p10 = scmp.ne.s32.totalorder %s2721_s20, %s2093_s15  ;;  %p2099_p12 = scmp.lt.s32.totalorder %s2565_s13, %s2093_s15 }
 0x13a   :  { %p2100_p13 = por %p2099_p12, %p2098_p11 }
 0x13c   :  { %p2101_p0 = pnand %p2100_p13, %p2094_p10 }
 0x13e   :  { %2104 = shalt.err (!%p2101_p0)  }
 0x13f   :  { %247 = dma.hbm_to_vmem [thread:$0]  %s234_s17, 16, %s2721_s20, [#allocation3 + $0xc] }
 0x140   :  { %s1417_s16 = sshll.u32 %s2718_s26, 4  ;;  %s2749_s0 = sld [smem:[#allocation5 + $0xe]] }
 0x141   :  { %s250_s29 = scalar_lea.hbm %s2966_s1, %s1417_s16 }
 0x142   :  { %s2105_s30 = scalar_lea.hbm %s250_s29, 16  ;;  %p2108_p2 = scmp.lt.u32.totalorder %s250_s29, %s2966_s1 }
 0x143   :  { %p2106_p1 = scmp.ne.s32.totalorder %s250_s29, %s2105_s30  ;;  %p2109_p3 = scmp.lt.u32.totalorder %s2556_s9, %s2105_s30 }
 0x144   :  { %p2111_p5 = scmp.lt.u32.totalorder %s2105_s30, %s250_s29 }
 0x145   :  { %p2110_p4 = por %p2109_p3, %p2108_p2 }
 0x147   :  { %p2112_p6 = por %p2111_p5, %p2110_p4 }
 0x149   :  { %p2113_p7 = pnand %p2112_p6, %p2106_p1 }
 0x14b   :  { %2116 = shalt.err (!%p2113_p7)  }
 0x14c   :  { %s2117_s20 = scalar_lea.vmem %s2736_s12, 16  ;;  %p2122_p9 = scmp.lt.s32.totalorder %s2736_s12, %s2535_s18 }
 0x14d   :  { %p2118_p8 = scmp.ne.s32.totalorder %s2736_s12, %s2117_s20  ;;  %p2123_p10 = scmp.lt.s32.totalorder %s2565_s13, %s2117_s20 }
 0x14f   :  { %p2124_p11 = por %p2123_p10, %p2122_p9 }
 0x151   :  { %p2125_p12 = pnand %p2124_p11, %p2118_p8 }
 0x153   :  { %2128 = shalt.err (!%p2125_p12)  }
 0x154   :  { %263 = dma.hbm_to_vmem [thread:$0]  %s250_s29, 16, %s2736_s12, [#allocation3 + $0xd] }
 0x155   :  { %s2466_s26 = smov [#allocation2 + $0xe]   ;;  %s2764_s8 = sld [smem:[#allocation5 + $0xf]] }
 0x156   :  { %s276_s7 = sshll.u32 %s2466_s26, 4  ;;  %s2467_s5 = smov [#allocation2 + $0xf]   ;;  %s277_s7 = int_to_ptr.vmem [resolvable:$true] %s276_s7 }
 0x157   :  { %s292_s10 = sshll.u32 %s2467_s5, 4  ;;  %s2766_s22 = sld [smem:[#allocation5 + $0x10]]  ;;  %s2769_s10 = int_to_ptr.vmem [resolvable:$true] %s292_s10 }
 0x158   :  { %s1419_s11 = sshll.u32 %s2749_s0, 4 }
 0x159   :  { %s266_s17 = scalar_lea.hbm %s2966_s1, %s1419_s11 }
 0x15a   :  { %s2129_s19 = scalar_lea.hbm %s266_s17, 16  ;;  %p2132_p0 = scmp.lt.u32.totalorder %s266_s17, %s2966_s1 }
 0x15b   :  { %p2130_p13 = scmp.ne.s32.totalorder %s266_s17, %s2129_s19  ;;  %p2133_p1 = scmp.lt.u32.totalorder %s2556_s9, %s2129_s19 }
 0x15c   :  { %p2135_p3 = scmp.lt.u32.totalorder %s2129_s19, %s266_s17 }
 0x15d   :  { %p2134_p2 = por %p2133_p1, %p2132_p0 }
 0x15f   :  { %p2136_p4 = por %p2135_p3, %p2134_p2 }
 0x161   :  { %p2137_p5 = pnand %p2136_p4, %p2130_p13 }
 0x163   :  { %2140 = shalt.err (!%p2137_p5)  }
 0x164   :  { %s2141_s25 = scalar_lea.vmem %s277_s7, 16  ;;  %p2146_p7 = scmp.lt.s32.totalorder %s277_s7, %s2535_s18 }
 0x165   :  { %p2142_p6 = scmp.ne.s32.totalorder %s277_s7, %s2141_s25  ;;  %p2147_p8 = scmp.lt.s32.totalorder %s2565_s13, %s2141_s25 }
 0x167   :  { %p2148_p9 = por %p2147_p8, %p2146_p7 }
 0x169   :  { %p2149_p10 = pnand %p2148_p9, %p2142_p6 }
 0x16b   :  { %2152 = shalt.err (!%p2149_p10)  }
 0x16c   :  { %279 = dma.hbm_to_vmem [thread:$0]  %s266_s17, 16, %s277_s7, [#allocation3 + $0xe] }
 0x16d   :  { %s1421_s15 = sshll.u32 %s2764_s8, 4  ;;  %s2468_s16 = smov [#allocation2 + $0x10]  }
 0x16e   :  { %s308_s0 = sshll.u32 %s2468_s16, 4  ;;  %s282_s29 = scalar_lea.hbm %s2966_s1, %s1421_s15  ;;  %s2784_s0 = int_to_ptr.vmem [resolvable:$true] %s308_s0 }
 0x16f   :  { %s2153_s30 = scalar_lea.hbm %s282_s29, 16  ;;  %p2156_p12 = scmp.lt.u32.totalorder %s282_s29, %s2966_s1 }
 0x170   :  { %p2154_p11 = scmp.ne.s32.totalorder %s282_s29, %s2153_s30  ;;  %p2157_p13 = scmp.lt.u32.totalorder %s2556_s9, %s2153_s30 }
 0x171   :  { %p2159_p1 = scmp.lt.u32.totalorder %s2153_s30, %s282_s29 }
 0x172   :  { %p2158_p0 = por %p2157_p13, %p2156_p12 }
 0x174   :  { %p2160_p2 = por %p2159_p1, %p2158_p0 }
 0x176   :  { %p2161_p3 = pnand %p2160_p2, %p2154_p11 }
 0x178   :  { %2164 = shalt.err (!%p2161_p3)  }
 0x179   :  { %s2165_s20 = scalar_lea.vmem %s2769_s10, 16  ;;  %p2170_p5 = scmp.lt.s32.totalorder %s2769_s10, %s2535_s18 }
 0x17a   :  { %p2166_p4 = scmp.ne.s32.totalorder %s2769_s10, %s2165_s20  ;;  %p2171_p6 = scmp.lt.s32.totalorder %s2565_s13, %s2165_s20 }
 0x17c   :  { %p2172_p7 = por %p2171_p6, %p2170_p5 }
 0x17e   :  { %p2173_p8 = pnand %p2172_p7, %p2166_p4 }
 0x180   :  { %2176 = shalt.err (!%p2173_p8)  }
 0x181   :  { %295 = dma.hbm_to_vmem [thread:$0]  %s282_s29, 16, %s2769_s10, [#allocation3 + $0xf] }
 0x182   :  { %s1423_s26 = sshll.u32 %s2766_s22, 4  ;;  %s2797_s7 = sld [smem:[#allocation5 + $0x11]] }
 0x183   :  { %s298_s11 = scalar_lea.hbm %s2966_s1, %s1423_s26 }
 0x184   :  { %s2177_s14 = scalar_lea.hbm %s298_s11, 16  ;;  %p2180_p10 = scmp.lt.u32.totalorder %s298_s11, %s2966_s1 }
 0x185   :  { %p2178_p9 = scmp.ne.s32.totalorder %s298_s11, %s2177_s14  ;;  %p2181_p11 = scmp.lt.u32.totalorder %s2556_s9, %s2177_s14 }
 0x186   :  { %p2183_p13 = scmp.lt.u32.totalorder %s2177_s14, %s298_s11 }
 0x187   :  { %p2182_p12 = por %p2181_p11, %p2180_p10 }
 0x189   :  { %p2184_p0 = por %p2183_p13, %p2182_p12 }
 0x18b   :  { %p2185_p1 = pnand %p2184_p0, %p2178_p9 }
 0x18d   :  { %2188 = shalt.err (!%p2185_p1)  }
 0x18e   :  { %s2189_s10 = scalar_lea.vmem %s2784_s0, 16  ;;  %p2194_p3 = scmp.lt.s32.totalorder %s2784_s0, %s2535_s18 }
 0x18f   :  { %p2190_p2 = scmp.ne.s32.totalorder %s2784_s0, %s2189_s10  ;;  %p2195_p4 = scmp.lt.s32.totalorder %s2565_s13, %s2189_s10 }
 0x191   :  { %p2196_p5 = por %p2195_p4, %p2194_p3 }
 0x193   :  { %p2197_p6 = pnand %p2196_p5, %p2190_p2 }
 0x195   :  { %2200 = shalt.err (!%p2197_p6)  }
 0x196   :  { %311 = dma.hbm_to_vmem [thread:$0]  %s298_s11, 16, %s2784_s0, [#allocation3 + $0x10] }
 0x197   :  { %s2469_s22 = smov [#allocation2 + $0x11]   ;;  %s2812_s2 = sld [smem:[#allocation5 + $0x12]] }
 0x198   :  { %s324_s19 = sshll.u32 %s2469_s22, 4  ;;  %s2470_s12 = smov [#allocation2 + $0x12]   ;;  %s325_s19 = int_to_ptr.vmem [resolvable:$true] %s324_s19 }
 0x199   :  { %s340_s25 = sshll.u32 %s2470_s12, 4  ;;  %s2814_s15 = sld [smem:[#allocation5 + $0x13]]  ;;  %s2817_s25 = int_to_ptr.vmem [resolvable:$true] %s340_s25 }
 0x19a   :  { %s1425_s16 = sshll.u32 %s2797_s7, 4 }
 0x19b   :  { %s314_s29 = scalar_lea.hbm %s2966_s1, %s1425_s16 }
 0x19c   :  { %s2201_s30 = scalar_lea.hbm %s314_s29, 16  ;;  %p2204_p8 = scmp.lt.u32.totalorder %s314_s29, %s2966_s1 }
 0x19d   :  { %p2202_p7 = scmp.ne.s32.totalorder %s314_s29, %s2201_s30  ;;  %p2205_p9 = scmp.lt.u32.totalorder %s2556_s9, %s2201_s30 }
 0x19e   :  { %p2207_p11 = scmp.lt.u32.totalorder %s2201_s30, %s314_s29 }
 0x19f   :  { %p2206_p10 = por %p2205_p9, %p2204_p8 }
 0x1a1   :  { %p2208_p12 = por %p2207_p11, %p2206_p10 }
 0x1a3   :  { %p2209_p13 = pnand %p2208_p12, %p2202_p7 }
 0x1a5   :  { %2212 = shalt.err (!%p2209_p13)  }
 0x1a6   :  { %s2213_s24 = scalar_lea.vmem %s325_s19, 16  ;;  %p2218_p1 = scmp.lt.s32.totalorder %s325_s19, %s2535_s18 }
 0x1a7   :  { %p2214_p0 = scmp.ne.s32.totalorder %s325_s19, %s2213_s24  ;;  %p2219_p2 = scmp.lt.s32.totalorder %s2565_s13, %s2213_s24 }
 0x1a9   :  { %p2220_p3 = por %p2219_p2, %p2218_p1 }
 0x1ab   :  { %p2221_p4 = pnand %p2220_p3, %p2214_p0 }
 0x1ad   :  { %2224 = shalt.err (!%p2221_p4)  }
 0x1ae   :  { %327 = dma.hbm_to_vmem [thread:$0]  %s314_s29, 16, %s325_s19, [#allocation3 + $0x11] }
 0x1af   :  { %s1427_s20 = sshll.u32 %s2812_s2, 4  ;;  %s2471_s26 = smov [#allocation2 + $0x13]  }
 0x1b0   :  { %s356_s7 = sshll.u32 %s2471_s26, 4  ;;  %s330_s11 = scalar_lea.hbm %s2966_s1, %s1427_s20  ;;  %s2832_s7 = int_to_ptr.vmem [resolvable:$true] %s356_s7 }
 0x1b1   :  { %s2225_s14 = scalar_lea.hbm %s330_s11, 16  ;;  %p2228_p6 = scmp.lt.u32.totalorder %s330_s11, %s2966_s1 }
 0x1b2   :  { %p2226_p5 = scmp.ne.s32.totalorder %s330_s11, %s2225_s14  ;;  %p2229_p7 = scmp.lt.u32.totalorder %s2556_s9, %s2225_s14 }
 0x1b3   :  { %p2231_p9 = scmp.lt.u32.totalorder %s2225_s14, %s330_s11 }
 0x1b4   :  { %p2230_p8 = por %p2229_p7, %p2228_p6 }
 0x1b6   :  { %p2232_p10 = por %p2231_p9, %p2230_p8 }
 0x1b8   :  { %p2233_p11 = pnand %p2232_p10, %p2226_p5 }
 0x1ba   :  { %2236 = shalt.err (!%p2233_p11)  }
 0x1bb   :  { %s2237_s10 = scalar_lea.vmem %s2817_s25, 16  ;;  %p2242_p13 = scmp.lt.s32.totalorder %s2817_s25, %s2535_s18 }
 0x1bc   :  { %p2238_p12 = scmp.ne.s32.totalorder %s2817_s25, %s2237_s10  ;;  %p2243_p0 = scmp.lt.s32.totalorder %s2565_s13, %s2237_s10 }
 0x1be   :  { %p2244_p1 = por %p2243_p0, %p2242_p13 }
 0x1c0   :  { %p2245_p2 = pnand %p2244_p1, %p2238_p12 }
 0x1c2   :  { %2248 = shalt.err (!%p2245_p2)  }
 0x1c3   :  { %343 = dma.hbm_to_vmem [thread:$0]  %s330_s11, 16, %s2817_s25, [#allocation3 + $0x12] }
 0x1c4   :  { %s1429_s22 = sshll.u32 %s2814_s15, 4  ;;  %s2845_s19 = sld [smem:[#allocation5 + $0x14]] }
 0x1c5   :  { %s346_s16 = scalar_lea.hbm %s2966_s1, %s1429_s22 }
 0x1c6   :  { %s2249_s27 = scalar_lea.hbm %s346_s16, 16  ;;  %p2252_p4 = scmp.lt.u32.totalorder %s346_s16, %s2966_s1 }
 0x1c7   :  { %p2250_p3 = scmp.ne.s32.totalorder %s346_s16, %s2249_s27  ;;  %p2253_p5 = scmp.lt.u32.totalorder %s2556_s9, %s2249_s27 }
 0x1c8   :  { %p2255_p7 = scmp.lt.u32.totalorder %s2249_s27, %s346_s16 }
 0x1c9   :  { %p2254_p6 = por %p2253_p5, %p2252_p4 }
 0x1cb   :  { %p2256_p8 = por %p2255_p7, %p2254_p6 }
 0x1cd   :  { %p2257_p9 = pnand %p2256_p8, %p2250_p3 }
 0x1cf   :  { %2260 = shalt.err (!%p2257_p9)  }
 0x1d0   :  { %s2261_s25 = scalar_lea.vmem %s2832_s7, 16  ;;  %p2266_p11 = scmp.lt.s32.totalorder %s2832_s7, %s2535_s18 }
 0x1d1   :  { %p2262_p10 = scmp.ne.s32.totalorder %s2832_s7, %s2261_s25  ;;  %p2267_p12 = scmp.lt.s32.totalorder %s2565_s13, %s2261_s25 }
 0x1d3   :  { %p2268_p13 = por %p2267_p12, %p2266_p11 }
 0x1d5   :  { %p2269_p0 = pnand %p2268_p13, %p2262_p10 }
 0x1d7   :  { %2272 = shalt.err (!%p2269_p0)  }
 0x1d8   :  { %359 = dma.hbm_to_vmem [thread:$0]  %s346_s16, 16, %s2832_s7, [#allocation3 + $0x13] }
 0x1d9   :  { %s2472_s15 = smov [#allocation2 + $0x14]   ;;  %s2860_s21 = sld [smem:[#allocation5 + $0x15]] }
 0x1da   :  { %s372_s30 = sshll.u32 %s2472_s15, 4  ;;  %s2473_s0 = smov [#allocation2 + $0x15]   ;;  %s373_s30 = int_to_ptr.vmem [resolvable:$true] %s372_s30 }
 0x1db   :  { %s388_s24 = sshll.u32 %s2473_s0, 4  ;;  %s2862_s20 = sld [smem:[#allocation5 + $0x16]]  ;;  %s2865_s24 = int_to_ptr.vmem [resolvable:$true] %s388_s24 }
 0x1dc   :  { %s1431_s26 = sshll.u32 %s2845_s19, 4 }
 0x1dd   :  { %s362_s11 = scalar_lea.hbm %s2966_s1, %s1431_s26 }
 0x1de   :  { %s2273_s14 = scalar_lea.hbm %s362_s11, 16  ;;  %p2276_p2 = scmp.lt.u32.totalorder %s362_s11, %s2966_s1 }
 0x1df   :  { %p2274_p1 = scmp.ne.s32.totalorder %s362_s11, %s2273_s14  ;;  %p2277_p3 = scmp.lt.u32.totalorder %s2556_s9, %s2273_s14 }
 0x1e0   :  { %p2279_p5 = scmp.lt.u32.totalorder %s2273_s14, %s362_s11 }
 0x1e1   :  { %p2278_p4 = por %p2277_p3, %p2276_p2 }
 0x1e3   :  { %p2280_p6 = por %p2279_p5, %p2278_p4 }
 0x1e5   :  { %p2281_p7 = pnand %p2280_p6, %p2274_p1 }
 0x1e7   :  { %2284 = shalt.err (!%p2281_p7)  }
 0x1e8   :  { %s2285_s17 = scalar_lea.vmem %s373_s30, 16  ;;  %p2290_p9 = scmp.lt.s32.totalorder %s373_s30, %s2535_s18 }
 0x1e9   :  { %p2286_p8 = scmp.ne.s32.totalorder %s373_s30, %s2285_s17  ;;  %p2291_p10 = scmp.lt.s32.totalorder %s2565_s13, %s2285_s17 }
 0x1eb   :  { %p2292_p11 = por %p2291_p10, %p2290_p9 }
 0x1ed   :  { %p2293_p12 = pnand %p2292_p11, %p2286_p8 }
 0x1ef   :  { %2296 = shalt.err (!%p2293_p12)  }
 0x1f0   :  { %375 = dma.hbm_to_vmem [thread:$0]  %s362_s11, 16, %s373_s30, [#allocation3 + $0x14] }
 0x1f1   :  { %s1433_s10 = sshll.u32 %s2860_s21, 4  ;;  %s2474_s22 = smov [#allocation2 + $0x16]  }
 0x1f2   :  { %s404_s19 = sshll.u32 %s2474_s22, 4  ;;  %s378_s16 = scalar_lea.hbm %s2966_s1, %s1433_s10  ;;  %s2880_s19 = int_to_ptr.vmem [resolvable:$true] %s404_s19 }
 0x1f3   :  { %s2297_s27 = scalar_lea.hbm %s378_s16, 16  ;;  %p2300_p0 = scmp.lt.u32.totalorder %s378_s16, %s2966_s1 }
 0x1f4   :  { %p2298_p13 = scmp.ne.s32.totalorder %s378_s16, %s2297_s27  ;;  %p2301_p1 = scmp.lt.u32.totalorder %s2556_s9, %s2297_s27 }
 0x1f5   :  { %p2303_p3 = scmp.lt.u32.totalorder %s2297_s27, %s378_s16 }
 0x1f6   :  { %p2302_p2 = por %p2301_p1, %p2300_p0 }
 0x1f8   :  { %p2304_p4 = por %p2303_p3, %p2302_p2 }
 0x1fa   :  { %p2305_p5 = pnand %p2304_p4, %p2298_p13 }
 0x1fc   :  { %2308 = shalt.err (!%p2305_p5)  }
 0x1fd   :  { %s2309_s25 = scalar_lea.vmem %s2865_s24, 16  ;;  %p2314_p7 = scmp.lt.s32.totalorder %s2865_s24, %s2535_s18 }
 0x1fe   :  { %p2310_p6 = scmp.ne.s32.totalorder %s2865_s24, %s2309_s25  ;;  %p2315_p8 = scmp.lt.s32.totalorder %s2565_s13, %s2309_s25 }
 0x200   :  { %p2316_p9 = por %p2315_p8, %p2314_p7 }
 0x202   :  { %p2317_p10 = pnand %p2316_p9, %p2310_p6 }
 0x204   :  { %2320 = shalt.err (!%p2317_p10)  }
 0x205   :  { %391 = dma.hbm_to_vmem [thread:$0]  %s378_s16, 16, %s2865_s24, [#allocation3 + $0x15] }
 0x206   :  { %s1435_s15 = sshll.u32 %s2862_s20, 4  ;;  %s1436_s30 = sld [smem:[#allocation5 + $0x17]] }
 0x207   :  { %s394_s26 = scalar_lea.hbm %s2966_s1, %s1435_s15 }
 0x208   :  { %s2321_s8 = scalar_lea.hbm %s394_s26, 16  ;;  %p2324_p12 = scmp.lt.u32.totalorder %s394_s26, %s2966_s1 }
 0x209   :  { %p2322_p11 = scmp.ne.s32.totalorder %s394_s26, %s2321_s8  ;;  %p2325_p13 = scmp.lt.u32.totalorder %s2556_s9, %s2321_s8 }
 0x20a   :  { %p2327_p1 = scmp.lt.u32.totalorder %s2321_s8, %s394_s26 }
 0x20b   :  { %p2326_p0 = por %p2325_p13, %p2324_p12 }
 0x20d   :  { %p2328_p2 = por %p2327_p1, %p2326_p0 }
 0x20f   :  { %p2329_p3 = pnand %p2328_p2, %p2322_p11 }
 0x211   :  { %2332 = shalt.err (!%p2329_p3)  }
 0x212   :  { %s2333_s24 = scalar_lea.vmem %s2880_s19, 16  ;;  %p2338_p5 = scmp.lt.s32.totalorder %s2880_s19, %s2535_s18 }
 0x213   :  { %p2334_p4 = scmp.ne.s32.totalorder %s2880_s19, %s2333_s24  ;;  %p2339_p6 = scmp.lt.s32.totalorder %s2565_s13, %s2333_s24 }
 0x215   :  { %p2340_p7 = por %p2339_p6, %p2338_p5 }
 0x217   :  { %p2341_p8 = pnand %p2340_p7, %p2334_p4 }
 0x219   :  { %2344 = shalt.err (!%p2341_p8)  }
 0x21a   :  { %407 = dma.hbm_to_vmem [thread:$0]  %s394_s26, 16, %s2880_s19, [#allocation3 + $0x16] }
 0x21b   :  { %s2475_s20 = smov [#allocation2 + $0x17]   ;;  %s1438_s23 = sld [smem:[#allocation5 + $0x18]] }
 0x21c   :  { %s420_s14 = sshll.u32 %s2475_s20, 4  ;;  %s2476_s7 = smov [#allocation2 + $0x18]   ;;  %s421_s14 = int_to_ptr.vmem [resolvable:$true] %s420_s14 }
 0x21d   :  { %s436_s17 = sshll.u32 %s2476_s7, 4  ;;  %s1437_s10 = sshll.u32 %s1436_s30, 4  ;;  %s2909_s17 = int_to_ptr.vmem [resolvable:$true] %s436_s17 }
 0x21e   :  { %s410_s12 = scalar_lea.hbm %s2966_s1, %s1437_s10 }
 0x21f   :  { %s2345_s16 = scalar_lea.hbm %s410_s12, 16  ;;  %p2348_p10 = scmp.lt.u32.totalorder %s410_s12, %s2966_s1 }
 0x220   :  { %p2346_p9 = scmp.ne.s32.totalorder %s410_s12, %s2345_s16  ;;  %p2349_p11 = scmp.lt.u32.totalorder %s2556_s9, %s2345_s16 }
 0x221   :  { %p2351_p13 = scmp.lt.u32.totalorder %s2345_s16, %s410_s12 }
 0x222   :  { %p2350_p12 = por %p2349_p11, %p2348_p10 }
 0x224   :  { %p2352_p0 = por %p2351_p13, %p2350_p12 }
 0x226   :  { %p2353_p1 = pnand %p2352_p0, %p2346_p9 }
 0x228   :  { %2356 = shalt.err (!%p2353_p1)  }
 0x229   :  { %s2357_s19 = scalar_lea.vmem %s421_s14, 16  ;;  %p2362_p3 = scmp.lt.s32.totalorder %s421_s14, %s2535_s18 }
 0x22a   :  { %p2358_p2 = scmp.ne.s32.totalorder %s421_s14, %s2357_s19  ;;  %p2363_p4 = scmp.lt.s32.totalorder %s2565_s13, %s2357_s19 }
 0x22c   :  { %p2364_p5 = por %p2363_p4, %p2362_p3 }
 0x22e   :  { %p2365_p6 = pnand %p2364_p5, %p2358_p2 }
 0x230   :  { %2368 = shalt.err (!%p2365_p6)  }
 0x231   :  { %423 = dma.hbm_to_vmem [thread:$0]  %s410_s12, 16, %s421_s14, [#allocation3 + $0x17] }
 0x232   :  { %s1439_s29 = sshll.u32 %s1438_s23, 4 }
 0x233   :  { %s426_s30 = scalar_lea.hbm %s2966_s1, %s1439_s29 }
 0x234   :  { %s2369_s21 = scalar_lea.hbm %s426_s30, 16  ;;  %p2372_p8 = scmp.lt.u32.totalorder %s426_s30, %s2966_s1 }
 0x235   :  { %p2370_p7 = scmp.ne.s32.totalorder %s426_s30, %s2369_s21  ;;  %p2373_p9 = scmp.lt.u32.totalorder %s2556_s9, %s2369_s21 }
 0x236   :  { %p2375_p11 = scmp.lt.u32.totalorder %s2369_s21, %s426_s30 }
 0x237   :  { %p2374_p10 = por %p2373_p9, %p2372_p8 }
 0x239   :  { %p2376_p12 = por %p2375_p11, %p2374_p10 }
 0x23b   :  { %p2377_p13 = pnand %p2376_p12, %p2370_p7 }
 0x23d   :  { %2380 = shalt.err (!%p2377_p13)  }
 0x23e   :  { %s2381_s8 = scalar_lea.vmem %s2909_s17, 16  ;;  %p2386_p1 = scmp.lt.s32.totalorder %s2909_s17, %s2535_s18 }
 0x23f   :  { %p2382_p0 = scmp.ne.s32.totalorder %s2909_s17, %s2381_s8  ;;  %p2387_p2 = scmp.lt.s32.totalorder %s2565_s13, %s2381_s8 }
 0x241   :  { %p2388_p3 = por %p2387_p2, %p2386_p1 }
 0x243   :  { %p2389_p4 = pnand %p2388_p3, %p2382_p0 }
 0x245   :  { %2392 = shalt.err (!%p2389_p4)  }
 0x246   :  { %439 = dma.hbm_to_vmem [thread:$0]  %s426_s30, 16, %s2909_s17, [#allocation3 + $0x18] }
 0x247   :  { %2397 = dma.done.wait [#allocation3], 16 }
 0x248   :  { %2398 = vsyncadd [#allocation3], 4294967280 }
 0x249   :  { %2399 = dma.done.wait [#allocation3 + $0x1], 16 }
 0x24a   :  { %2400 = vsyncadd [#allocation3 + $0x1], 4294967280 }
 0x24b   :  { %2401 = dma.done.wait [#allocation3 + $0x2], 16 }
 0x24c   :  { %2402 = vsyncadd [#allocation3 + $0x2], 4294967280 }
 0x24d   :  { %2403 = dma.done.wait [#allocation3 + $0x3], 16 }
 0x24e   :  { %2404 = vsyncadd [#allocation3 + $0x3], 4294967280 }
 0x24f   :  { %2405 = dma.done.wait [#allocation3 + $0x4], 16 }
 0x250   :  { %2406 = vsyncadd [#allocation3 + $0x4], 4294967280 }
 0x251   :  { %2407 = dma.done.wait [#allocation3 + $0x5], 16 }
 0x252   :  { %2408 = vsyncadd [#allocation3 + $0x5], 4294967280 }
 0x253   :  { %2409 = dma.done.wait [#allocation3 + $0x6], 16 }
 0x254   :  { %2410 = vsyncadd [#allocation3 + $0x6], 4294967280 }
 0x255   :  { %2411 = dma.done.wait [#allocation3 + $0x7], 16 }
 0x256   :  { %2412 = vsyncadd [#allocation3 + $0x7], 4294967280 }
 0x257   :  { %2413 = dma.done.wait [#allocation3 + $0x8], 16 }
 0x258   :  { %2414 = vsyncadd [#allocation3 + $0x8], 4294967280 }
 0x259   :  { %2415 = dma.done.wait [#allocation3 + $0x9], 16 }
 0x25a   :  { %2416 = vsyncadd [#allocation3 + $0x9], 4294967280 }
 0x25b   :  { %2417 = dma.done.wait [#allocation3 + $0xa], 16 }
 0x25c   :  { %2418 = vsyncadd [#allocation3 + $0xa], 4294967280 }
 0x25d   :  { %2419 = dma.done.wait [#allocation3 + $0xb], 16 }
 0x25e   :  { %2420 = vsyncadd [#allocation3 + $0xb], 4294967280 }
 0x25f   :  { %2421 = dma.done.wait [#allocation3 + $0xc], 16 }
 0x260   :  { %2422 = vsyncadd [#allocation3 + $0xc], 4294967280 }
 0x261   :  { %2423 = dma.done.wait [#allocation3 + $0xd], 16 }
 0x262   :  { %2424 = vsyncadd [#allocation3 + $0xd], 4294967280 }
 0x263   :  { %2425 = dma.done.wait [#allocation3 + $0xe], 16 }
 0x264   :  { %2426 = vsyncadd [#allocation3 + $0xe], 4294967280 }
 0x265   :  { %2427 = dma.done.wait [#allocation3 + $0xf], 16 }
 0x266   :  { %2428 = vsyncadd [#allocation3 + $0xf], 4294967280 }
 0x267   :  { %2429 = dma.done.wait [#allocation3 + $0x10], 16 }
 0x268   :  { %2430 = vsyncadd [#allocation3 + $0x10], 4294967280 }
 0x269   :  { %2431 = dma.done.wait [#allocation3 + $0x11], 16 }
 0x26a   :  { %2432 = vsyncadd [#allocation3 + $0x11], 4294967280 }
 0x26b   :  { %2433 = dma.done.wait [#allocation3 + $0x12], 16 }
 0x26c   :  { %2434 = vsyncadd [#allocation3 + $0x12], 4294967280 }
 0x26d   :  { %2435 = dma.done.wait [#allocation3 + $0x13], 16 }
 0x26e   :  { %2436 = vsyncadd [#allocation3 + $0x13], 4294967280 }
 0x26f   :  { %2437 = dma.done.wait [#allocation3 + $0x14], 16 }
 0x270   :  { %2438 = vsyncadd [#allocation3 + $0x14], 4294967280 }
 0x271   :  { %2439 = dma.done.wait [#allocation3 + $0x15], 16 }
 0x272   :  { %2440 = vsyncadd [#allocation3 + $0x15], 4294967280 }
 0x273   :  { %2441 = dma.done.wait [#allocation3 + $0x16], 16 }
 0x274   :  { %2442 = vsyncadd [#allocation3 + $0x16], 4294967280 }
 0x275   :  { %2443 = dma.done.wait [#allocation3 + $0x17], 16 }
 0x276   :  { %2444 = vsyncadd [#allocation3 + $0x17], 4294967280 }
 0x277   :  { %2445 = dma.done.wait [#allocation3 + $0x18], 16 }
 0x278   :  { %2446 = vsyncadd [#allocation3 + $0x18], 4294967280  ;;  %624 = vmatprep.mubr.f32.mxu0 %v2451_v1  ;;  %v496_v2 = vld [vmem:[#allocation7 + $0x8] sm:$0xff]  ;;  %v499_v3 = vld [vmem:[#allocation7 + $0x20] sm:$0xff]  ;;  %vm826_vm1 = vcmask 261120   ;;  %vm2478_vm3 = vmmov 0  }
 0x279   :  { %v495_v4 = vld [vmem:[#allocation7] sm:$0xff]  ;;  %v1616_v5 = vpack.c.bf16 %v499_v3, %v496_v2  ;;  %v498_v6 = vld [vmem:[#allocation7 + $0x18] sm:$0xff]  ;;  %v505_v8 = vld [vmem:[#allocation7 + $0x50] sm:$0xff]  ;;  %vm1111_vm4 = vcmask 253952  }
 0x27a   :  { %v502_v7 = vld [vmem:[#allocation7 + $0x38] sm:$0xff]  ;;  %v1618_v9 = vpack.c.bf16 %v498_v6, %v495_v4  ;;  %v501_v11 = vld [vmem:[#allocation7 + $0x30] sm:$0xff]  ;;  %v504_v12 = vld [vmem:[#allocation7 + $0x48] sm:$0xff] }
 0x27b   :  { %v1620_v10 = vpack.c.bf16 %v505_v8, %v502_v7  ;;  %v508_v13 = vld [vmem:[#allocation7 + $0x68] sm:$0xff]  ;;  %1617 = vmatprep.subr.bf16.mxu0 %v1616_v5  ;;  %v511_v14 = vld [vmem:[#allocation7 + $0x80] sm:$0xff]  ;;  %v1622_v15 = vpack.c.bf16 %v504_v12, %v501_v11  ;;  %v510_v18 = vld [vmem:[#allocation7 + $0x78] sm:$0xff] }
 0x27c   :  { %1619 = vmatpush1.bf16.msra.mxu0 %v1618_v9  ;;  %v1624_v16 = vpack.c.bf16 %v511_v14, %v508_v13  ;;  %v507_v17 = vld [vmem:[#allocation7 + $0x60] sm:$0xff]  ;;  %v514_v19 = vld [vmem:[#allocation7 + $0x98] sm:$0xff]  ;;  %v517_v20 = vld [vmem:[#allocation7 + $0xb0] sm:$0xff] }
 0x27d   :  { %1621 = vmatprep.subr.bf16.mxu0 %v1620_v10  ;;  %v1626_v21 = vpack.c.bf16 %v510_v18, %v507_v17  ;;  %v1628_v22 = vpack.c.bf16 %v517_v20, %v514_v19  ;;  %v513_v23 = vld [vmem:[#allocation7 + $0x90] sm:$0xff]  ;;  %v516_v24 = vld [vmem:[#allocation7 + $0xa8] sm:$0xff]  ;;  %v523_v26 = vld [vmem:[#allocation7 + $0xe0] sm:$0xff] }
 0x27e   :  { %v520_v25 = vld [vmem:[#allocation7 + $0xc8] sm:$0xff]  ;;  %v491_v27 = vld [vmem:[#allocation2] sm:$0xff]  ;;  %v1630_v28 = vpack.c.bf16 %v516_v24, %v513_v23  ;;  %v529_v33 = vld [vmem:[#allocation7 + $0x110] sm:$0xff] }
 0x27f   :  { %1560 = vmatprep.mubr.f32.mxu1 %v491_v27  ;;  %v1632_v29 = vpack.c.bf16 %v523_v26, %v520_v25  ;;  %v519_v30 = vld [vmem:[#allocation7 + $0xc0] sm:$0xff]  ;;  %v522_v31 = vld [vmem:[#allocation7 + $0xd8] sm:$0xff]  ;;  %v525_v36 = vld [vmem:[#allocation7 + $0xf0] sm:$0xff] }
 0x280   :  { %1623 = vmatpush1.bf16.msra.mxu0 %v1622_v15  ;;  %v526_v32 = vld [vmem:[#allocation7 + $0xf8] sm:$0xff]  ;;  %v1634_v34 = vpack.c.bf16 %v522_v31, %v519_v30  ;;  %v528_v37 = vld [vmem:[#allocation7 + $0x108] sm:$0xff]  ;;  %v535_v39 = vld [vmem:[#allocation7 + $0x140] sm:$0xff]  ;;  %v545_v15 = vlaneseq }
 0x281   :  { %1625 = vmatprep.subr.bf16.mxu0 %v1624_v16  ;;  %v1636_v35 = vpack.c.bf16 %v529_v33, %v526_v32  ;;  %v532_v38 = vld [vmem:[#allocation7 + $0x128] sm:$0xff]  ;;  %v1638_v40 = vpack.c.bf16 %v528_v37, %v525_v36  ;;  %v531_v42 = vld [vmem:[#allocation7 + $0x120] sm:$0xff]  ;;  %v534_v43 = vld [vmem:[#allocation7 + $0x138] sm:$0xff] }
 0x282   :  { %v1640_v41 = vpack.c.bf16 %v535_v39, %v532_v38  ;;  %v538_v44 = vld [vmem:[#allocation7 + $0x158] sm:$0xff]  ;;  %v541_v45 = vld [vmem:[#allocation7 + $0x170] sm:$0xff]  ;;  %v1642_v46 = vpack.c.bf16 %v534_v43, %v531_v42  ;;  %v540_v49 = vld [vmem:[#allocation7 + $0x168] sm:$0xff]  ;;  %v2934_v16 = vshrl.u32 %v545_v15, 7 }
 0x283   :  { %v1644_v47 = vpack.c.bf16 %v541_v45, %v538_v44  ;;  %v537_v48 = vld [vmem:[#allocation7 + $0x150] sm:$0xff]  ;;  %v492_v51 = vld [vmem:[#allocation2 + $0x8] sm:$0xff]  ;;  %v506_v58 = vld [vmem:[#allocation7 + $0x58] sm:$0xff] }
 0x284   :  { %1627 = vmatpush1.bf16.msra.mxu0 %v1626_v21  ;;  %v1646_v50 = vpack.c.bf16 %v540_v49, %v537_v48  ;;  %v493_v52 = vld [vmem:[#allocation2 + $0x10] sm:$0xff]  ;;  %v494_v53 = vld [vmem:[#allocation2 + $0x18] sm:$0xff]  ;;  %v503_v56 = vld [vmem:[#allocation7 + $0x40] sm:$0xff]  ;;  %v547_v17 = vsub.s32 0, %v2934_v16  ;;  %v551_v20 = vsub.s32 1, %v2934_v16 }
 0x285   :  { %1629 = vmatprep.subr.bf16.mxu0 %v1628_v22  ;;  %v497_v54 = vld [vmem:[#allocation7 + $0x10] sm:$0xff]  ;;  %v500_v55 = vld [vmem:[#allocation7 + $0x28] sm:$0xff]  ;;  %v1652_v59 = vpack.c.bf16 %v506_v58, %v503_v56  ;;  %v515_v63 = vld [vmem:[#allocation7 + $0xa0] sm:$0xff] }
 0x286   :  { %v1648_v57 = vpack.c.bf16 %v500_v55, %v497_v54  ;;  %v509_v60 = vld [vmem:[#allocation7 + $0x70] sm:$0xff]  ;;  %v512_v61 = vld [vmem:[#allocation7 + $0x88] sm:$0xff]  ;;  %v518_v0 = vld [vmem:[#allocation7 + $0xb8] sm:$0xff] }
 0x287   :  { %v1656_v62 = vpack.c.bf16 %v512_v61, %v509_v60  ;;  %v1660_v2 = vpack.c.bf16 %v518_v0, %v515_v63  ;;  %v521_v3 = vld [vmem:[#allocation7 + $0xd0] sm:$0xff]  ;;  %v524_v4 = vld [vmem:[#allocation7 + $0xe8] sm:$0xff]  ;;  %v527_v6 = vld [vmem:[#allocation7 + $0x100] sm:$0xff] }
 0x288   :  { %1631 = vmatpush1.bf16.msra.mxu0 %v1630_v28  ;;  %1649 = vmatprep.subr.bf16.mxu1 %v1648_v57  ;;  %v1664_v5 = vpack.c.bf16 %v524_v4, %v521_v3  ;;  %v530_v7 = vld [vmem:[#allocation7 + $0x118] sm:$0xff]  ;;  %v533_v9 = vld [vmem:[#allocation7 + $0x130] sm:$0xff]  ;;  %v536_v10 = vld [vmem:[#allocation7 + $0x148] sm:$0xff] }
 0x289   :  { %1633 = vmatprep.subr.bf16.mxu0 %v1632_v29  ;;  %1651 = vmatpush3.bf16.msra.mxu1 %v1648_v57  ;;  %v1668_v8 = vpack.c.bf16 %v530_v7, %v527_v6  ;;  %v1672_v11 = vpack.c.bf16 %v536_v10, %v533_v9  ;;  %v539_v12 = vld [vmem:[#allocation7 + $0x160] sm:$0xff]  ;;  %v542_v13 = vld [vmem:[#allocation7 + $0x178] sm:$0xff]  ;;  %vm1704_vm2 = vmpackc.low %vm826_vm1, %vm826_vm1 }
 0x28a   :  { %1653 = vmatprep.subr.bf16.mxu1 %v1652_v59  ;;  %v1676_v14 = vpack.c.bf16 %v542_v13, %v539_v12  ;;  %v543_v18 = vld [vmem:[%s2968_s3] sm:$0x7] }
 0x28b   :  { %v548_v19 = vrot.slane %v543_v18, %v547_v17  ;;  %v552_v24 = vrot.slane %v543_v18, %v551_v20 }
 0x28c   :  { %1635 = vmatpush1.bf16.msra.mxu0 %v1634_v34 }
 0x28d   :  { %1637 = vmatprep.subr.bf16.mxu0 %v1636_v35  ;;  %1655 = vmatpush3.bf16.msra.mxu1 %v1652_v59 }
 0x28e   :  { %1657 = vmatprep.subr.bf16.mxu1 %v1656_v62 }
 0x290   :  { %1639 = vmatpush1.bf16.msra.mxu0 %v1638_v40  ;;  %v820_v40 = vand.u32 127, %v545_v15 }
 0x291   :  { %1641 = vmatprep.subr.bf16.mxu0 %v1640_v41  ;;  %1659 = vmatpush3.bf16.msra.mxu1 %v1656_v62 }
 0x292   :  { %1661 = vmatprep.subr.bf16.mxu1 %v1660_v2  ;;  %vm821_vm0 = vcmp.lt.s32.totalorder %v820_v40, 25 }
 0x294   :  { %1643 = vmatpush1.bf16.msra.mxu0 %v1642_v46 }
 0x295   :  { %1645 = vmatprep.subr.bf16.mxu0 %v1644_v47  ;;  %1663 = vmatpush3.bf16.msra.mxu1 %v1660_v2  ;;  %v2477_v2 = vmov 0.0|0.0  }
 0x296   :  { %1665 = vmatprep.subr.bf16.mxu1 %v1664_v5 }
 0x298   :  { %1647 = vmatpush1.bf16.msra.mxu0 %v1646_v50 }
 0x299   :  { %1667 = vmatpush3.bf16.msra.mxu1 %v1664_v5 }
 0x29a   :  { %1669 = vmatprep.subr.bf16.mxu1 %v1668_v8 }
 0x29b   :  { %625 = vmatmul.mubr.f32.vlgmr.msra.gmra.mrb[0].mxu0 %v491_v27 }
 0x29c   :  { %630 = vmatprep.mubr.f32.mxu0 %v2451_v1 }
 0x29d   :  { %1671 = vmatpush3.bf16.msra.mxu1 %v1668_v8 }
 0x29e   :  { %1673 = vmatprep.subr.bf16.mxu1 %v1672_v11 }
 0x29f   :  { %631 = vmatmul.mubr.f32.gmra.mrb[2].mxu0 %v492_v51 }
 0x2a0   :  { %636 = vmatprep.mubr.f32.mxu0 %v2451_v1 }
 0x2a1   :  { %1675 = vmatpush3.bf16.msra.mxu1 %v1672_v11 }
 0x2a2   :  { %1677 = vmatprep.subr.bf16.mxu1 %v1676_v14 }
 0x2a3   :  { %637 = vmatmul.mubr.f32.gmra.mrb[4].mxu0 %v493_v52 }
 0x2a4   :  { %642 = vmatprep.mubr.f32.mxu0 %v2451_v1 }
 0x2a5   :  { %1679 = vmatpush3.bf16.msra.mxu1 %v1676_v14 }
 0x2a7   :  { %643 = vmatmul.mubr.f32.gmra.mrb[6].mxu0 %v494_v53 }
 0x2a8   :  { %1561 = vmatmul.mubr.f32.vlgmr.msra.gmra.mrb[0].mxu1 %v492_v51 }
 0x2a9   :  { %1563 = vmatprep.mubr.f32.mxu1 %v493_v52 }
 0x2ac   :  { %1564 = vmatmul.mubr.f32.gmra.mrb[2].mxu1 %v494_v53  ;;  %v555_v53 = vsub.s32 2, %v2934_v16 }
 0x2ae   :  { %v556_v54 = vrot.slane %v543_v18, %v555_v53 }
 0x36e   :  { %v626_v21 = vpop.f32.mrb[0].mxu0 }
 0x36f   :  { %v627_v22 = vadd.f32 %v626_v21, %v548_v19  ;;  %v628_v23 = vpop.f32.mrb[1].mxu0 }
 0x370   :  { %v629_v27 = vadd.f32 %v628_v23, %v552_v24  ;;  %v2479_v23 = vmov 1.0  }
 0x371   :  { %1574 = vmatprep.mubr.f32.mxu0 %v627_v22 }
 0x372   :  { %v632_v25 = vpop.f32.mrb[2].mxu0 }
 0x373   :  { %v634_v26 = vpop.f32.mrb[3].mxu0  ;;  %v633_v37 = vadd.f32 %v632_v25, %v548_v19  ;;  %v2480_v25 = vmov 0  }
 0x374   :  { %v635_v28 = vadd.f32 %v634_v26, %v552_v24  ;;  %1744 = vset.pattern.permute.xlu0 %v2480_v25 }
 0x376   :  { %v1680_v29 = vpack.c.bf16 %v635_v28, %v629_v27  ;;  %v638_v30 = vpop.f32.mrb[4].mxu0 }
 0x377   :  { %v640_v31 = vpop.f32.mrb[5].mxu0  ;;  %v639_v38 = vadd.f32 %v638_v30, %v548_v19 }
 0x378   :  { %1681 = vmatprep.subr.bf16.mxu0 %v1680_v29  ;;  %v641_v34 = vadd.f32 %v640_v31, %v552_v24 }
 0x379   :  { %1683 = vmatpush3.bf16.xpose.msra.mxu0 %v1680_v29 }
 0x37a   :  { %v644_v32 = vpop.f32.mrb[6].mxu0 }
 0x37b   :  { %v646_v33 = vpop.f32.mrb[7].mxu0  ;;  %v645_v39 = vadd.f32 %v644_v32, %v548_v19  ;;  %v1562_v55 = vpop.f32.mrb[0].mxu1 }
 0x37c   :  { %v647_v35 = vadd.f32 %v646_v33, %v552_v24  ;;  %v721_v56 = vadd.f32 %v1562_v55, %v556_v54  ;;  %v715_v57 = vpop.f32.mrb[1].mxu1  ;;  %v1094_v24 = vld [vmem:[#allocation6] sm:$0x1] }
 0x37d   :  { %v716_v58 = vadd.f32 %v715_v57, %v556_v54 }
 0x37e   :  { %v1684_v36 = vpack.c.bf16 %v647_v35, %v641_v34 }
 0x37f   :  { %v1688_v59 = vpack.c.bf16 %v721_v56, %v716_v58  ;;  %v1565_v60 = vpop.f32.mrb[2].mxu1 }
 0x380   :  { %1685 = vmatprep.subr.bf16.mxu0 %v1684_v36  ;;  %v731_v61 = vadd.f32 %v1565_v60, %v556_v54  ;;  %v725_v62 = vpop.f32.mrb[3].mxu1 }
 0x381   :  { %1687 = vmatpush3.bf16.xpose.msra.mxu0 %v1684_v36  ;;  %v726_v63 = vadd.f32 %v725_v62, %v556_v54  ;;  %1689 = vmatprep.subr.bf16.mxu1 %v1688_v59 }
 0x382   :  { %1691 = vmatpush3.bf16.msra.mxu1 %v1688_v59  ;;  %1702 = vmatprep.subr.bf16.mxu0 %v2477_v2 }
 0x383   :  { %v1692_v0 = vpack.c.bf16 %v731_v61, %v726_v63 }
 0x385   :  { %1693 = vmatprep.subr.bf16.mxu1 %v1692_v0 }
 0x386   :  { %1695 = vmatpush3.bf16.msra.mxu1 %v1692_v0 }
 0x387   :  { %1696 = vmatprep.subr.bf16.mxu1 %v2477_v2 }
 0x388   :  { %1575 = vmatmul.mubr.f32.vlgmr.msra.gmra.mrb[8].mxu0 %v633_v37 }
 0x389   :  { %1577 = vmatprep.mubr.f32.mxu0 %v639_v38 }
 0x38c   :  { %1578 = vmatmul.mubr.f32.gmra.mrb[10].mxu0 %v645_v39 }
 0x38d   :  { %1613 = vmatprep.mubr.msk.f32.mxu0 %vm2478_vm3, %v2451_v1 }
 0x45b   :  { %v1576_v41 = vpop.f32.mrb[8].mxu0 }
 0x45c   :  { %v800_v42 = vpop.f32.mrb[9].mxu0  ;;  %v823_v45 = vsel %vm821_vm0, %v1576_v41, -1e+30 }
 0x45d   :  { %v822_v43 = vsel %vm821_vm0, %v800_v42, -1e+30  ;;  %v830_v49 = vsel %vm826_vm1, %v823_v45, -inf }
 0x45e   :  { %v827_v44 = vsel %vm826_vm1, %v822_v43, -inf }
 0x45f   :  { %828 = vmax.xlane.f32.xlu0 %v827_v44  ;;  %v1579_v46 = vpop.f32.mrb[10].mxu0 }
 0x460   :  { %v810_v47 = vpop.f32.mrb[11].mxu0  ;;  %v825_v51 = vsel %vm821_vm0, %v1579_v46, -1e+30 }
 0x461   :  { %v824_v48 = vsel %vm821_vm0, %v810_v47, -1e+30  ;;  %v836_v52 = vsel %vm826_vm1, %v825_v51, -inf }
 0x462   :  { %v833_v50 = vsel %vm826_vm1, %v824_v48, -inf }
 0x463   :  { %831 = vmax.xlane.f32.xlu0 %v830_v49  ;;  %834 = vmax.xlane.f32.xlu1 %v833_v50 }
 0x467   :  { %837 = vmax.xlane.f32.xlu1 %v836_v52 }
 0x479   :  { %1097 = vperm.xlu0 %1744, %v1094_v24  }
 0x4ec   :  { %v829_v3 = vpop.xlane.xlu0 %828 }
 0x4ed   :  { %v839_v4 = vsub.f32 %v822_v43, %v829_v3 }
 0x4ef   :  { %v843_v5 = vmul.f32 1.442695, %v839_v4 }
 0x4f0   :  { %v832_v6 = vpop.xlane.xlu0 %831  ;;  %v835_v7 = vpop.xlane.xlu1 %834 }
 0x4f1   :  { %1745 = vpow2.f32 %v843_v5  ;;  %v840_v8 = vsub.f32 %v823_v45, %v832_v6  ;;  %v841_v9 = vsub.f32 %v824_v48, %v835_v7 }
 0x4f3   :  { %v845_v10 = vmul.f32 1.442695, %v840_v8  ;;  %v847_v11 = vmul.f32 1.442695, %v841_v9 }
 0x4f4   :  { %v838_v12 = vpop.xlane.xlu1 %837 }
 0x4f5   :  { %1747 = vpow2.f32 %v845_v10  ;;  %v842_v13 = vsub.f32 %v825_v51, %v838_v12 }
 0x4f6   :  { %1749 = vpow2.f32 %v847_v11 }
 0x4f7   :  { %v849_v14 = vmul.f32 1.442695, %v842_v13 }
 0x4f8   :  { %v1098_v34 = vpop.permute.xlu0 %1097 }
 0x4f9   :  { %1751 = vpow2.f32 %v849_v14  ;;  %v1103_v36 = vrot.slane %v1098_v34, %v547_v17 }
 0x4fb   :  { %v1746_v15 = vpop.eup %1745 }
 0x4fc   :  { %1588 = vmatprep.mubr.msk.f32.mxu1 %vm826_vm1, %v1746_v15 }
 0x4ff   :  { %v1748_v18 = vpop.eup %1747 }
 0x500   :  { %v1750_v19 = vpop.eup %1749  ;;  %1589 = vmatmul.mubr.msk.f32.vlgmr.msra.gmra.mrb[4].mxu1 %vm826_vm1, %v1748_v18  ;;  %v1703_v20 = vpack.c.bf16 %v1748_v18, %v1746_v15 }
 0x501   :  { %1591 = vmatprep.mubr.msk.f32.mxu1 %vm826_vm1, %v1750_v19 }
 0x502   :  { %1705 = vmatpush3.bf16.xpose.msk.msra.mxu0 %vm1704_vm2, %v1703_v20 }
 0x503   :  { %v1752_v21 = vpop.eup %1751  ;;  %1706 = vmatprep.subr.bf16.mxu0 %v2477_v2 }
 0x504   :  { %1592 = vmatmul.mubr.msk.f32.gmra.mrb[6].mxu1 %vm826_vm1, %v1752_v21  ;;  %v1707_v22 = vpack.c.bf16 %v1752_v21, %v1750_v19 }
 0x505   :  { %1602 = vmatprep.mubr.msk.f32.mxu1 %vm2478_vm3, %v2451_v1  ;;  %v948_v1 = vld [vmem:[%s2969_s4] sm:$0x1] }
 0x50a   :  { %1709 = vmatpush3.bf16.xpose.msk.msra.mxu0 %vm1704_vm2, %v1707_v22 }
 0x511   :  { %1614 = vmatmul.mubr.msk.f32.vlgmr.msra.gmra.mrb[12].mxu0 %vm826_vm1, %v2479_v23 }
 0x5d3   :  { %v1590_v26 = vpop.f32.mrb[4].mxu1 }
 0x5d4   :  { %v929_v27 = vpop.f32.mrb[5].mxu1 }
 0x5d5   :  { %v1697_v28 = vpack.c.bf16 %v1590_v26, %v929_v27 }
 0x5d7   :  { %v1593_v29 = vpop.f32.mrb[6].mxu1  ;;  %1698 = vmatpush3.bf16.xpose.msra.mxu1 %v1697_v28 }
 0x5d8   :  { %v939_v30 = vpop.f32.mrb[7].mxu1  ;;  %1699 = vmatprep.subr.bf16.mxu1 %v2477_v2 }
 0x5d9   :  { %v1700_v31 = vpack.c.bf16 %v1593_v29, %v939_v30 }
 0x5df   :  { %1701 = vmatpush3.bf16.xpose.msra.mxu1 %v1700_v31 }
 0x5e4   :  { %v1088_v32 = vpop.f32.mrb[12].mxu0 }
 0x5e5   :  { %v1615_v33 = vpop.f32.mrb[13].mxu0  ;;  %1753 = vrcp.f32 %v1088_v32 }
 0x5e6   :  { %1603 = vmatmul.mubr.f32.vlgmr.msra.gmra.mrb[8].mxu1 %v948_v1 }
 0x5ef   :  { %v1754_v35 = vpop.eup %1753 }
 0x6b9   :  { %v1015_v37 = vpop.f32.mrb[8].mxu1 }
 0x6ba   :  { %v1093_v38 = vmul.f32 %v1754_v35, %v1015_v37  ;;  %v1604_v39 = vpop.f32.mrb[9].mxu1 }
 0x6bc   :  { %v1104_v40 = vadd.f32 %v1103_v36, %v1093_v38 }
 0x6be   :  { %v1449_v41 = vmul.f32 -1.442695, %v1104_v40 }
 0x6c0   :  { %1755 = vpow2.f32 %v1449_v41 }
 0x6ca   :  { %v1756_v42 = vpop.eup %1755 }
 0x6cb   :  { %v1108_v43 = vadd.f32 1.0, %v1756_v42 }
 0x6cd   :  { %1757 = vrcp.f32 %v1108_v43 }
 0x6d7   :  { %v1758_v44 = vpop.eup %1757 }
 0x6d8   :  { %1112 = vst.msk [vmem:[%s2970_s6] sm:$0x1] %vm1111_vm4, %v1758_v44 }
 0x6d9   :  { %1117 = vsyncpa [#allocation8], 1 }
 0x6da   :  { %1118 = vsyncmov [#allocation3] }
 0x6dd   :  { %s1119_s5 = vpop.sfrf %1118 }
 0x6de   :  { %p1450_p5 = scmp.ne.s32.totalorder %s1119_s5, 0 }
 0x6e0   :  { %1123 = shalt.err (%p1450_p5)  }
 0x6e1   :  { %1125 = vsyncmov [#allocation3 + $0x1] }
 0x6e4   :  { %s1126_s11 = vpop.sfrf %1125 }
 0x6e5   :  { %p1451_p6 = scmp.ne.s32.totalorder %s1126_s11, 0 }
 0x6e7   :  { %1130 = shalt.err (%p1451_p6)  }
 0x6e8   :  { %1132 = vsyncmov [#allocation3 + $0x2] }
 0x6eb   :  { %s1133_s24 = vpop.sfrf %1132 }
 0x6ec   :  { %p1452_p7 = scmp.ne.s32.totalorder %s1133_s24, 0 }
 0x6ee   :  { %1137 = shalt.err (%p1452_p7)  }
 0x6ef   :  { %1139 = vsyncmov [#allocation3 + $0x3] }
 0x6f2   :  { %s1140_s20 = vpop.sfrf %1139 }
 0x6f3   :  { %p1453_p8 = scmp.ne.s32.totalorder %s1140_s20, 0 }
 0x6f5   :  { %1144 = shalt.err (%p1453_p8)  }
 0x6f6   :  { %1146 = vsyncmov [#allocation3 + $0x4] }
 0x6f9   :  { %s1147_s14 = vpop.sfrf %1146 }
 0x6fa   :  { %p1454_p9 = scmp.ne.s32.totalorder %s1147_s14, 0 }
 0x6fc   :  { %1151 = shalt.err (%p1454_p9)  }
 0x6fd   :  { %1153 = vsyncmov [#allocation3 + $0x5] }
 0x700   :  { %s1154_s6 = vpop.sfrf %1153 }
 0x701   :  { %p1455_p10 = scmp.ne.s32.totalorder %s1154_s6, 0 }
 0x703   :  { %1158 = shalt.err (%p1455_p10)  }
 0x704   :  { %1160 = vsyncmov [#allocation3 + $0x6] }
 0x707   :  { %s1161_s23 = vpop.sfrf %1160 }
 0x708   :  { %p1456_p11 = scmp.ne.s32.totalorder %s1161_s23, 0 }
 0x70a   :  { %1165 = shalt.err (%p1456_p11)  }
 0x70b   :  { %1167 = vsyncmov [#allocation3 + $0x7] }
 0x70e   :  { %s1168_s7 = vpop.sfrf %1167 }
 0x70f   :  { %p1457_p12 = scmp.ne.s32.totalorder %s1168_s7, 0 }
 0x711   :  { %1172 = shalt.err (%p1457_p12)  }
 0x712   :  { %1174 = vsyncmov [#allocation3 + $0x8] }
 0x715   :  { %s1175_s17 = vpop.sfrf %1174 }
 0x716   :  { %p1458_p13 = scmp.ne.s32.totalorder %s1175_s17, 0 }
 0x718   :  { %1179 = shalt.err (%p1458_p13)  }
 0x719   :  { %1181 = vsyncmov [#allocation3 + $0x9] }
 0x71c   :  { %s1182_s10 = vpop.sfrf %1181 }
 0x71d   :  { %p1459_p0 = scmp.ne.s32.totalorder %s1182_s10, 0 }
 0x71f   :  { %1186 = shalt.err (%p1459_p0)  }
 0x720   :  { %1188 = vsyncmov [#allocation3 + $0xa] }
 0x723   :  { %s1189_s22 = vpop.sfrf %1188 }
 0x724   :  { %p1460_p1 = scmp.ne.s32.totalorder %s1189_s22, 0 }
 0x726   :  { %1193 = shalt.err (%p1460_p1)  }
 0x727   :  { %1195 = vsyncmov [#allocation3 + $0xb] }
 0x72a   :  { %s1196_s2 = vpop.sfrf %1195 }
 0x72b   :  { %p1461_p2 = scmp.ne.s32.totalorder %s1196_s2, 0 }
 0x72d   :  { %1200 = shalt.err (%p1461_p2)  }
 0x72e   :  { %1202 = vsyncmov [#allocation3 + $0xc] }
 0x731   :  { %s1203_s12 = vpop.sfrf %1202 }
 0x732   :  { %p1462_p3 = scmp.ne.s32.totalorder %s1203_s12, 0 }
 0x734   :  { %1207 = shalt.err (%p1462_p3)  }
 0x735   :  { %1209 = vsyncmov [#allocation3 + $0xd] }
 0x738   :  { %s1210_s16 = vpop.sfrf %1209 }
 0x739   :  { %p1463_p4 = scmp.ne.s32.totalorder %s1210_s16, 0 }
 0x73b   :  { %1214 = shalt.err (%p1463_p4)  }
 0x73c   :  { %1216 = vsyncmov [#allocation3 + $0xe] }
 0x73f   :  { %s1217_s27 = vpop.sfrf %1216 }
 0x740   :  { %p1464_p5 = scmp.ne.s32.totalorder %s1217_s27, 0 }
 0x742   :  { %1221 = shalt.err (%p1464_p5)  }
 0x743   :  { %1223 = vsyncmov [#allocation3 + $0xf] }
 0x746   :  { %s1224_s28 = vpop.sfrf %1223 }
 0x747   :  { %p1465_p6 = scmp.ne.s32.totalorder %s1224_s28, 0 }
 0x749   :  { %1228 = shalt.err (%p1465_p6)  }
 0x74a   :  { %1230 = vsyncmov [#allocation3 + $0x10] }
 0x74d   :  { %s1231_s19 = vpop.sfrf %1230 }
 0x74e   :  { %p1466_p7 = scmp.ne.s32.totalorder %s1231_s19, 0 }
 0x750   :  { %1235 = shalt.err (%p1466_p7)  }
 0x751   :  { %1237 = vsyncmov [#allocation3 + $0x11] }
 0x754   :  { %s1238_s29 = vpop.sfrf %1237 }
 0x755   :  { %p1467_p8 = scmp.ne.s32.totalorder %s1238_s29, 0 }
 0x757   :  { %1242 = shalt.err (%p1467_p8)  }
 0x758   :  { %1244 = vsyncmov [#allocation3 + $0x12] }
 0x75b   :  { %s1245_s25 = vpop.sfrf %1244 }
 0x75c   :  { %p1468_p9 = scmp.ne.s32.totalorder %s1245_s25, 0 }
 0x75e   :  { %1249 = shalt.err (%p1468_p9)  }
 0x75f   :  { %1251 = vsyncmov [#allocation3 + $0x13] }
 0x762   :  { %s1252_s15 = vpop.sfrf %1251 }
 0x763   :  { %p1469_p10 = scmp.ne.s32.totalorder %s1252_s15, 0 }
 0x765   :  { %1256 = shalt.err (%p1469_p10)  }
 0x766   :  { %1258 = vsyncmov [#allocation3 + $0x14] }
 0x769   :  { %s1259_s30 = vpop.sfrf %1258 }
 0x76a   :  { %p1470_p11 = scmp.ne.s32.totalorder %s1259_s30, 0 }
 0x76c   :  { %1263 = shalt.err (%p1470_p11)  }
 0x76d   :  { %1265 = vsyncmov [#allocation3 + $0x15] }
 0x770   :  { %s1266_s21 = vpop.sfrf %1265 }
 0x771   :  { %p1471_p12 = scmp.ne.s32.totalorder %s1266_s21, 0 }
 0x773   :  { %1270 = shalt.err (%p1471_p12)  }
 0x774   :  { %1272 = vsyncmov [#allocation3 + $0x16] }
 0x777   :  { %s1273_s0 = vpop.sfrf %1272 }
 0x778   :  { %p1472_p13 = scmp.ne.s32.totalorder %s1273_s0, 0 }
 0x77a   :  { %1277 = shalt.err (%p1472_p13)  }
 0x77b   :  { %1279 = vsyncmov [#allocation3 + $0x17] }
 0x77e   :  { %s1280_s26 = vpop.sfrf %1279 }
 0x77f   :  { %p1473_p0 = scmp.ne.s32.totalorder %s1280_s26, 0 }
 0x781   :  { %1284 = shalt.err (%p1473_p0)  }
 0x782   :  { %1286 = vsyncmov [#allocation3 + $0x18] }
 0x785   :  { %s1287_s8 = vpop.sfrf %1286 }
 0x786   :  { %p1474_p1 = scmp.ne.s32.totalorder %s1287_s8, 0 }
 0x788   :  { %1291 = shalt.err (%p1474_p1)  }
 0x789   :  { %1293 = vsyncmov [#allocation3 + $0x19] }
 0x78c   :  { %s1294_s1 = vpop.sfrf %1293 }
 0x78d   :  { %p1475_p2 = scmp.ne.s32.totalorder %s1294_s1, 0 }
 0x78f   :  { %1298 = shalt.err (%p1475_p2)  }
 0x790   :  { %1300 = vsyncmov [#allocation3 + $0x1a] }
 0x793   :  { %s1301_s18 = vpop.sfrf %1300 }
 0x794   :  { %p1476_p3 = scmp.ne.s32.totalorder %s1301_s18, 0 }
 0x796   :  { %1305 = shalt.err (%p1476_p3)  }
 0x797   :  { %1307 = vsyncmov [#allocation3 + $0x1b] }
 0x79a   :  { %s1308_s3 = vpop.sfrf %1307 }
 0x79b   :  { %p1477_p4 = scmp.ne.s32.totalorder %s1308_s3, 0 }
 0x79d   :  { %1312 = shalt.err (%p1477_p4)  }
 0x79e   :  { %1314 = vsyncmov [#allocation3 + $0x1c] }
 0x7a1   :  { %s1315_s9 = vpop.sfrf %1314 }
 0x7a2   :  { %p1478_p5 = scmp.ne.s32.totalorder %s1315_s9, 0 }
 0x7a4   :  { %1319 = shalt.err (%p1478_p5)  }
 0x7a5   :  { %1321 = vsyncmov [#allocation3 + $0x1d] }
 0x7a8   :  { %s1322_s4 = vpop.sfrf %1321 }
 0x7a9   :  { %p1479_p6 = scmp.ne.s32.totalorder %s1322_s4, 0 }
 0x7ab   :  { %1326 = shalt.err (%p1479_p6)  }
 0x7ac   :  { %1328 = vsyncmov [#allocation3 + $0x1e] }
 0x7af   :  { %s1329_s13 = vpop.sfrf %1328 }
 0x7b0   :  { %p1480_p7 = scmp.ne.s32.totalorder %s1329_s13, 0 }
 0x7b2   :  { %1333 = shalt.err (%p1480_p7)  }
 0x7b3   :  { %1335 = vsyncmov [#allocation3 + $0x1f] }
 0x7b6   :  { %s1336_s5 = vpop.sfrf %1335 }
 0x7b7   :  { %p1481_p8 = scmp.ne.s32.totalorder %s1336_s5, 0 }
 0x7b9   :  { %1340 = shalt.err (%p1481_p8)  }

</bundles_post_ra>
